<compile_context>
chip_gen: v6e
topology: v6e:2x2x1
jax: 0.10.0
libtpu: 0.0.40
codegen_flags: <defaults>
</compile_context>

<pallas_src>
import jax
import jax.numpy as jnp
from jax import lax
from jax.experimental import pallas as pl
from jax.experimental.pallas import tpu as pltpu


def lstm_kernel(x_ref, wih_ref, whh_ref, b_ref, h_out_ref, h_sc, c_sc):
    """One time-chunk of the LSTM recurrence.

    x_ref:   (Tt*Bp, E)   time-major flattened embedded inputs for this chunk
    wih_ref: (E, 4*Hp)    input->gates weights (pre-transposed, gate-padded)
    whh_ref: (Hp, 4*Hp)   hidden->gates weights (pre-transposed, padded)
    b_ref:   (1, 4*Hp)    b_ih + b_hh (gate-padded)
    h_out_ref: (Bp, Hp)   final hidden state (written on last grid step)
    h_sc, c_sc: (Bp, Hp)  VMEM-resident carry across grid steps
    """
    TtB, _ = x_ref.shape
    Bp, Hp = h_sc.shape
    Tt = TtB // Bp  # static

    # Init carry on the first chunk.
    @pl.when(pl.program_id(0) == 0)
    def _init():
        h_sc[...] = jnp.zeros_like(h_sc)
        c_sc[...] = jnp.zeros_like(c_sc)

    # Hoisted input projection + bias for the whole chunk: one large MXU matmul
    # off the serial chain (M = Tt*Bp instead of Bp).
    x_gates = (
        jnp.dot(x_ref[...], wih_ref[...], preferred_element_type=jnp.float32)
        + b_ref[...]
    )  # (Tt*Bp, 4*Hp), f32

    whh = whh_ref[...]
    h = h_sc[...]
    c = c_sc[...]

    # Statically unrolled recurrence over the chunk (Tt is small by construction).
    for t in range(Tt):
        g = x_gates[t * Bp:(t + 1) * Bp, :] + jnp.dot(
            h.astype(whh.dtype), whh, preferred_element_type=jnp.float32
        )  # (Bp, 4*Hp)
        # Lane-aligned gate slabs (Hp is a multiple of 128). PyTorch order i,f,g,o.
        i_g = jax.nn.sigmoid(g[:, 0 * Hp:1 * Hp])
        f_g = jax.nn.sigmoid(g[:, 1 * Hp:2 * Hp])
        g_g = jnp.tanh(g[:, 2 * Hp:3 * Hp])
        o_g = jax.nn.sigmoid(g[:, 3 * Hp:4 * Hp])
        c = f_g * c + i_g * g_g
        h = o_g * jnp.tanh(c)

    h_sc[...] = h
    c_sc[...] = c

    @pl.when(pl.program_id(0) == pl.num_programs(0) - 1)
    def _finalize():
        h_out_ref[...] = h


def _round_up(x, m):
    return ((x + m - 1) // m) * m


def _pick_time_chunk(T, max_chunk=32):
    """Largest divisor of T that is <= max_chunk (keeps the static unroll small)."""
    for c in range(min(T, max_chunk), 0, -1):
        if T % c == 0:
            return c
    return T


def code_encoder_forward(tokens, embed_table, w_ih, w_hh, b_ih, b_hh,
                         matmul_dtype=jnp.float32):
    """Equivalent of CodeEncoder.forward(tokens) -> (B, H)."""
    B, T = tokens.shape
    E = embed_table.shape[1]
    H = w_hh.shape[1]

    Bp = _round_up(max(B, 8), 8)       # fill f32 sublanes
    Hp = _round_up(max(H, 128), 128)   # lane-aligned gates & output

    # --- Embedding gather (JAX glue), directly time-major flattened ---------
    # row index t*Bp + b  <->  tokens[b, t];  padded batch rows use token 0
    # (padding_idx row of the table is zero, and they are sliced off anyway).
    tok_p = jnp.pad(tokens, ((0, Bp - B), (0, 0)))                 # (Bp, T)
    flat_ids = jnp.transpose(tok_p).reshape(-1)                    # (T*Bp,)
    x_flat = jnp.take(embed_table, flat_ids, axis=0)               # (T*Bp, E)
    x_flat = x_flat.astype(matmul_dtype)

    # --- Weight preparation: transpose to (in, 4H), pad each gate to Hp -----
    def pad_gate_cols(w_t):  # (in, 4H) -> (in, 4*Hp), per-gate zero padding
        n_in = w_t.shape[0]
        w4 = w_t.reshape(n_in, 4, H)
        w4 = jnp.pad(w4, ((0, 0), (0, 0), (0, Hp - H)))
        return w4.reshape(n_in, 4 * Hp)

    wih_t = pad_gate_cols(jnp.asarray(w_ih, jnp.float32).T)                     # (E, 4Hp)
    whh_t = pad_gate_cols(jnp.asarray(w_hh, jnp.float32).T)                     # (H, 4Hp)
    whh_t = jnp.pad(whh_t, ((0, Hp - H), (0, 0)))                               # (Hp, 4Hp)
    bias = (jnp.asarray(b_ih, jnp.float32) + jnp.asarray(b_hh, jnp.float32))
    bias = jnp.pad(bias.reshape(4, H), ((0, 0), (0, Hp - H))).reshape(1, 4 * Hp)

    wih_t = wih_t.astype(matmul_dtype)
    whh_t = whh_t.astype(matmul_dtype)

    # --- Time-chunked grid ---------------------------------------------------
    Tt = _pick_time_chunk(T)
    n_chunks = T // Tt

    h_pad = pl.pallas_call(
        lstm_kernel,
        out_shape=jax.ShapeDtypeStruct((Bp, Hp), jnp.float32),
        grid=(n_chunks,),
        in_specs=[
            pl.BlockSpec((Tt * Bp, E), lambda i: (i, 0)),      # per-chunk inputs
            pl.BlockSpec((E, 4 * Hp), lambda i: (0, 0)),       # resident weights
            pl.BlockSpec((Hp, 4 * Hp), lambda i: (0, 0)),
            pl.BlockSpec((1, 4 * Hp), lambda i: (0, 0)),
        ],
        out_specs=pl.BlockSpec((Bp, Hp), lambda i: (0, 0)),
        scratch_shapes=[
            pltpu.VMEM((Bp, Hp), jnp.float32),   # h carry
            pltpu.VMEM((Bp, Hp), jnp.float32),   # c carry
        ],
        compiler_params=pltpu.CompilerParams(
            dimension_semantics=("arbitrary",),
        ),
    )(x_flat, wih_t, whh_t, bias)

    # TODO(synk): for very large batches on v7x, add a leading "parallel" grid
    # axis over batch tiles to shard across the two TensorCores.
    return h_pad[:B, :H]


def code_encoder_reference(tokens, embed_table, w_ih, w_hh, b_ih, b_hh):
    """Pure-JAX reference matching torch.nn.LSTM semantics (gate order i,f,g,o)."""
    B, T = tokens.shape
    H = w_hh.shape[1]
    x = jnp.take(embed_table, tokens, axis=0)  # (B, T, E)

    def step(carry, x_t):
        h, c = carry
        gates = x_t @ w_ih.T + h @ w_hh.T + b_ih + b_hh
        i = jax.nn.sigmoid(gates[:, 0 * H:1 * H])
        f = jax.nn.sigmoid(gates[:, 1 * H:2 * H])
        g = jnp.tanh(gates[:, 2 * H:3 * H])
        o = jax.nn.sigmoid(gates[:, 3 * H:4 * H])
        c = f * c + i * g
        h = o * jnp.tanh(c)
        return (h, c), None

    init = (jnp.zeros((B, H), jnp.float32), jnp.zeros((B, H), jnp.float32))
    (h, _), _ = lax.scan(step, init, jnp.transpose(x, (1, 0, 2)))
    return h


if __name__ == "__main__":
    # Small, deterministic problem sizes consistent with the module defaults.
    vocab_size = 64
    embed_dim = 64   # nn.Embedding(vocab_size, 64)
    hidden = 64      # nn.LSTM(64, 64)
    B, T = 4, 8

    key = jax.random.PRNGKey(0)
    k_emb, k_wih, k_whh, k_bih, k_bhh, k_tok = jax.random.split(key, 6)

    # Embedding: N(0,1) init, padding_idx=0 row zeroed (as in nn.Embedding).
    embed_table = jax.random.normal(k_emb, (vocab_size, embed_dim), jnp.float32)
    embed_table = embed_table.at[0].set(0.0)

    # LSTM params: uniform(-1/sqrt(H), 1/sqrt(H)) like torch.nn.LSTM.
    bound = 1.0 / jnp.sqrt(jnp.float32(hidden))
    w_ih = jax.random.uniform(k_wih, (4 * hidden, embed_dim), jnp.float32, -bound, bound)
    w_hh = jax.random.uniform(k_whh, (4 * hidden, hidden), jnp.float32, -bound, bound)
    b_ih = jax.random.uniform(k_bih, (4 * hidden,), jnp.float32, -bound, bound)
    b_hh = jax.random.uniform(k_bhh, (4 * hidden,), jnp.float32, -bound, bound)

    # Token ids (include some padding zeros).
    tokens = jax.random.randint(k_tok, (B, T), 0, vocab_size, jnp.int32)
    tokens = tokens.at[:, -2:].set(0)

    out = code_encoder_forward(tokens, embed_table, w_ih, w_hh, b_ih, b_hh)
    out = jax.block_until_ready(out)

    ref = code_encoder_reference(tokens, embed_table, w_ih, w_hh, b_ih, b_hh)
    ref = jax.block_until_ready(ref)

    assert out.shape == (B, hidden), out.shape
    assert jnp.allclose(out, ref, atol=1e-5, rtol=1e-5), float(jnp.abs(out - ref).max())

    print("KERNEL_OK")
</pallas_src>

<mosaic_0001>
module attributes {stable_mosaic.version = 11 : i64} {
  func.func @lstm_kernel(%arg0: i32, %arg1: memref<64x64xf32, #tpu.memory_space<vmem>>, %arg2: memref<64x512xf32, #tpu.memory_space<vmem>>, %arg3: memref<128x512xf32, #tpu.memory_space<vmem>>, %arg4: memref<1x512xf32, #tpu.memory_space<vmem>>, %arg5: memref<8x128xf32, #tpu.memory_space<vmem>>, %arg6: memref<8x128xf32, #tpu.memory_space<vmem>>, %arg7: memref<8x128xf32, #tpu.memory_space<vmem>>) attributes {dimension_semantics = [#tpu.dimension_semantics<arbitrary>], iteration_bounds = array<i64: 1>, scalar_prefetch = 0 : i64, scratch_operands = 2 : i64, tpu.core_type = #tpu.core_type<tc>, window_params = [{transform_indices = @transform_0, window_bounds = array<i64: 64, 64>}, {pipeline_mode = #tpu.pipeline_mode<synchronous>, transform_indices = @transform_1, window_bounds = array<i64: 64, 512>}, {pipeline_mode = #tpu.pipeline_mode<synchronous>, transform_indices = @transform_2, window_bounds = array<i64: 128, 512>}, {pipeline_mode = #tpu.pipeline_mode<synchronous>, transform_indices = @transform_3, window_bounds = array<i64: 1, 512>}, {pipeline_mode = #tpu.pipeline_mode<synchronous>, transform_indices = @transform_4, window_bounds = array<i64: 8, 128>}]} {
    %c0_i32 = arith.constant 0 : i32
    %0 = arith.cmpi eq, %arg0, %c0_i32 : i32
    %1 = arith.extui %0 : i1 to i32
    %c0_i32_0 = arith.constant 0 : i32
    %2 = arith.cmpi ne, %1, %c0_i32_0 : i32
    scf.if %2 {
      %cst_50 = arith.constant 0.000000e+00 : f32
      %241 = vector.broadcast %cst_50 : f32 to vector<8x128xf32>
      %c0_51 = arith.constant 0 : index
      %c0_52 = arith.constant 0 : index
      %242 = vector.load %arg6[%c0_51, %c0_52] : memref<8x128xf32, #tpu.memory_space<vmem>>, vector<8x128xf32>
      tpu.vector_store %arg6[%c0_51, %c0_52], %241 {strides = array<i32>} : memref<8x128xf32, #tpu.memory_space<vmem>>, vector<8x128xf32>,
      %cst_53 = arith.constant 0.000000e+00 : f32
      %243 = vector.broadcast %cst_53 : f32 to vector<8x128xf32>
      %c0_54 = arith.constant 0 : index
      %c0_55 = arith.constant 0 : index
      %244 = vector.load %arg7[%c0_54, %c0_55] : memref<8x128xf32, #tpu.memory_space<vmem>>, vector<8x128xf32>
      tpu.vector_store %arg7[%c0_54, %c0_55], %243 {strides = array<i32>} : memref<8x128xf32, #tpu.memory_space<vmem>>, vector<8x128xf32>,
    } else {
    }
    %c0 = arith.constant 0 : index
    %c0_1 = arith.constant 0 : index
    %3 = vector.load %arg1[%c0, %c0_1] : memref<64x64xf32, #tpu.memory_space<vmem>>, vector<64x64xf32>
    %c0_2 = arith.constant 0 : index
    %c0_3 = arith.constant 0 : index
    %4 = vector.load %arg2[%c0_2, %c0_3] : memref<64x512xf32, #tpu.memory_space<vmem>>, vector<64x512xf32>
    %cst = arith.constant dense<0.000000e+00> : vector<64x512xf32>
    %5 = tpu.matmul %3, %4, %cst {dimension_numbers = #tpu.dot_dimension_numbers<[1], [0], [0], [1], [0, 0, 1, 1], [], []>} : vector<64x64xf32>, vector<64x512xf32>, vector<64x512xf32> -> vector<64x512xf32>
    %c0_4 = arith.constant 0 : index
    %c0_5 = arith.constant 0 : index
    %6 = vector.load %arg4[%c0_4, %c0_5] : memref<1x512xf32, #tpu.memory_space<vmem>>, vector<1x512xf32>
    %7 = vector.broadcast %6 : vector<1x512xf32> to vector<64x512xf32>
    %8 = arith.addf %5, %7 : vector<64x512xf32>
    %c0_6 = arith.constant 0 : index
    %c0_7 = arith.constant 0 : index
    %9 = vector.load %arg3[%c0_6, %c0_7] : memref<128x512xf32, #tpu.memory_space<vmem>>, vector<128x512xf32>
    %c0_8 = arith.constant 0 : index
    %c0_9 = arith.constant 0 : index
    %10 = vector.load %arg6[%c0_8, %c0_9] : memref<8x128xf32, #tpu.memory_space<vmem>>, vector<8x128xf32>
    %c0_10 = arith.constant 0 : index
    %c0_11 = arith.constant 0 : index
    %11 = vector.load %arg7[%c0_10, %c0_11] : memref<8x128xf32, #tpu.memory_space<vmem>>, vector<8x128xf32>
    %12 = vector.extract_strided_slice %8 {offsets = [0, 0], sizes = [8, 512], strides = [1, 1]} : vector<64x512xf32> to vector<8x512xf32>
    %cst_12 = arith.constant dense<0.000000e+00> : vector<8x512xf32>
    %13 = tpu.matmul %10, %9, %cst_12 {dimension_numbers = #tpu.dot_dimension_numbers<[1], [0], [0], [1], [0, 0, 1, 1], [], []>} : vector<8x128xf32>, vector<128x512xf32>, vector<8x512xf32> -> vector<8x512xf32>
    %14 = arith.addf %12, %13 : vector<8x512xf32>
    %15 = vector.extract_strided_slice %14 {offsets = [0, 0], sizes = [8, 128], strides = [1, 1]} : vector<8x512xf32> to vector<8x128xf32>
    %16 = arith.negf %15 : vector<8x128xf32>
    %17 = math.exp %16 : vector<8x128xf32>
    %cst_13 = arith.constant 1.000000e+00 : f32
    %18 = vector.broadcast %cst_13 : f32 to vector<8x128xf32>
    %19 = arith.addf %18, %17 : vector<8x128xf32>
    %20 = arith.divf %18, %19 : vector<8x128xf32>
    %21 = vector.extract_strided_slice %14 {offsets = [0, 128], sizes = [8, 128], strides = [1, 1]} : vector<8x512xf32> to vector<8x128xf32>
    %22 = arith.negf %21 : vector<8x128xf32>
    %23 = math.exp %22 : vector<8x128xf32>
    %cst_14 = arith.constant 1.000000e+00 : f32
    %24 = vector.broadcast %cst_14 : f32 to vector<8x128xf32>
    %25 = arith.addf %24, %23 : vector<8x128xf32>
    %26 = arith.divf %24, %25 : vector<8x128xf32>
    %27 = vector.extract_strided_slice %14 {offsets = [0, 256], sizes = [8, 128], strides = [1, 1]} : vector<8x512xf32> to vector<8x128xf32>
    %28 = math.tanh %27 : vector<8x128xf32>
    %29 = vector.extract_strided_slice %14 {offsets = [0, 384], sizes = [8, 128], strides = [1, 1]} : vector<8x512xf32> to vector<8x128xf32>
    %30 = arith.negf %29 : vector<8x128xf32>
    %31 = math.exp %30 : vector<8x128xf32>
    %cst_15 = arith.constant 1.000000e+00 : f32
    %32 = vector.broadcast %cst_15 : f32 to vector<8x128xf32>
    %33 = arith.addf %32, %31 : vector<8x128xf32>
    %34 = arith.divf %32, %33 : vector<8x128xf32>
    %35 = arith.mulf %26, %11 : vector<8x128xf32>
    %36 = arith.mulf %20, %28 : vector<8x128xf32>
    %37 = arith.addf %35, %36 : vector<8x128xf32>
    %38 = math.tanh %37 : vector<8x128xf32>
    %39 = arith.mulf %34, %38 : vector<8x128xf32>
    %40 = vector.extract_strided_slice %8 {offsets = [8, 0], sizes = [8, 512], strides = [1, 1]} : vector<64x512xf32> to vector<8x512xf32>
    %cst_16 = arith.constant dense<0.000000e+00> : vector<8x512xf32>
    %41 = tpu.matmul %39, %9, %cst_16 {dimension_numbers = #tpu.dot_dimension_numbers<[1], [0], [0], [1], [0, 0, 1, 1], [], []>} : vector<8x128xf32>, vector<128x512xf32>, vector<8x512xf32> -> vector<8x512xf32>
    %42 = arith.addf %40, %41 : vector<8x512xf32>
    %43 = vector.extract_strided_slice %42 {offsets = [0, 0], sizes = [8, 128], strides = [1, 1]} : vector<8x512xf32> to vector<8x128xf32>
    %44 = arith.negf %43 : vector<8x128xf32>
    %45 = math.exp %44 : vector<8x128xf32>
    %cst_17 = arith.constant 1.000000e+00 : f32
    %46 = vector.broadcast %cst_17 : f32 to vector<8x128xf32>
    %47 = arith.addf %46, %45 : vector<8x128xf32>
    %48 = arith.divf %46, %47 : vector<8x128xf32>
    %49 = vector.extract_strided_slice %42 {offsets = [0, 128], sizes = [8, 128], strides = [1, 1]} : vector<8x512xf32> to vector<8x128xf32>
    %50 = arith.negf %49 : vector<8x128xf32>
    %51 = math.exp %50 : vector<8x128xf32>
    %cst_18 = arith.constant 1.000000e+00 : f32
    %52 = vector.broadcast %cst_18 : f32 to vector<8x128xf32>
    %53 = arith.addf %52, %51 : vector<8x128xf32>
    %54 = arith.divf %52, %53 : vector<8x128xf32>
    %55 = vector.extract_strided_slice %42 {offsets = [0, 256], sizes = [8, 128], strides = [1, 1]} : vector<8x512xf32> to vector<8x128xf32>
    %56 = math.tanh %55 : vector<8x128xf32>
    %57 = vector.extract_strided_slice %42 {offsets = [0, 384], sizes = [8, 128], strides = [1, 1]} : vector<8x512xf32> to vector<8x128xf32>
    %58 = arith.negf %57 : vector<8x128xf32>
    %59 = math.exp %58 : vector<8x128xf32>
    %cst_19 = arith.constant 1.000000e+00 : f32
    %60 = vector.broadcast %cst_19 : f32 to vector<8x128xf32>
    %61 = arith.addf %60, %59 : vector<8x128xf32>
    %62 = arith.divf %60, %61 : vector<8x128xf32>
    %63 = arith.mulf %54, %37 : vector<8x128xf32>
    %64 = arith.mulf %48, %56 : vector<8x128xf32>
    %65 = arith.addf %63, %64 : vector<8x128xf32>
    %66 = math.tanh %65 : vector<8x128xf32>
    %67 = arith.mulf %62, %66 : vector<8x128xf32>
    %68 = vector.extract_strided_slice %8 {offsets = [16, 0], sizes = [8, 512], strides = [1, 1]} : vector<64x512xf32> to vector<8x512xf32>
    %cst_20 = arith.constant dense<0.000000e+00> : vector<8x512xf32>
    %69 = tpu.matmul %67, %9, %cst_20 {dimension_numbers = #tpu.dot_dimension_numbers<[1], [0], [0], [1], [0, 0, 1, 1], [], []>} : vector<8x128xf32>, vector<128x512xf32>, vector<8x512xf32> -> vector<8x512xf32>
    %70 = arith.addf %68, %69 : vector<8x512xf32>
    %71 = vector.extract_strided_slice %70 {offsets = [0, 0], sizes = [8, 128], strides = [1, 1]} : vector<8x512xf32> to vector<8x128xf32>
    %72 = arith.negf %71 : vector<8x128xf32>
    %73 = math.exp %72 : vector<8x128xf32>
    %cst_21 = arith.constant 1.000000e+00 : f32
    %74 = vector.broadcast %cst_21 : f32 to vector<8x128xf32>
    %75 = arith.addf %74, %73 : vector<8x128xf32>
    %76 = arith.divf %74, %75 : vector<8x128xf32>
    %77 = vector.extract_strided_slice %70 {offsets = [0, 128], sizes = [8, 128], strides = [1, 1]} : vector<8x512xf32> to vector<8x128xf32>
    %78 = arith.negf %77 : vector<8x128xf32>
    %79 = math.exp %78 : vector<8x128xf32>
    %cst_22 = arith.constant 1.000000e+00 : f32
    %80 = vector.broadcast %cst_22 : f32 to vector<8x128xf32>
    %81 = arith.addf %80, %79 : vector<8x128xf32>
    %82 = arith.divf %80, %81 : vector<8x128xf32>
    %83 = vector.extract_strided_slice %70 {offsets = [0, 256], sizes = [8, 128], strides = [1, 1]} : vector<8x512xf32> to vector<8x128xf32>
    %84 = math.tanh %83 : vector<8x128xf32>
    %85 = vector.extract_strided_slice %70 {offsets = [0, 384], sizes = [8, 128], strides = [1, 1]} : vector<8x512xf32> to vector<8x128xf32>
    %86 = arith.negf %85 : vector<8x128xf32>
    %87 = math.exp %86 : vector<8x128xf32>
    %cst_23 = arith.constant 1.000000e+00 : f32
    %88 = vector.broadcast %cst_23 : f32 to vector<8x128xf32>
    %89 = arith.addf %88, %87 : vector<8x128xf32>
    %90 = arith.divf %88, %89 : vector<8x128xf32>
    %91 = arith.mulf %82, %65 : vector<8x128xf32>
    %92 = arith.mulf %76, %84 : vector<8x128xf32>
    %93 = arith.addf %91, %92 : vector<8x128xf32>
    %94 = math.tanh %93 : vector<8x128xf32>
    %95 = arith.mulf %90, %94 : vector<8x128xf32>
    %96 = vector.extract_strided_slice %8 {offsets = [24, 0], sizes = [8, 512], strides = [1, 1]} : vector<64x512xf32> to vector<8x512xf32>
    %cst_24 = arith.constant dense<0.000000e+00> : vector<8x512xf32>
    %97 = tpu.matmul %95, %9, %cst_24 {dimension_numbers = #tpu.dot_dimension_numbers<[1], [0], [0], [1], [0, 0, 1, 1], [], []>} : vector<8x128xf32>, vector<128x512xf32>, vector<8x512xf32> -> vector<8x512xf32>
    %98 = arith.addf %96, %97 : vector<8x512xf32>
    %99 = vector.extract_strided_slice %98 {offsets = [0, 0], sizes = [8, 128], strides = [1, 1]} : vector<8x512xf32> to vector<8x128xf32>
    %100 = arith.negf %99 : vector<8x128xf32>
    %101 = math.exp %100 : vector<8x128xf32>
    %cst_25 = arith.constant 1.000000e+00 : f32
    %102 = vector.broadcast %cst_25 : f32 to vector<8x128xf32>
    %103 = arith.addf %102, %101 : vector<8x128xf32>
    %104 = arith.divf %102, %103 : vector<8x128xf32>
    %105 = vector.extract_strided_slice %98 {offsets = [0, 128], sizes = [8, 128], strides = [1, 1]} : vector<8x512xf32> to vector<8x128xf32>
    %106 = arith.negf %105 : vector<8x128xf32>
    %107 = math.exp %106 : vector<8x128xf32>
    %cst_26 = arith.constant 1.000000e+00 : f32
    %108 = vector.broadcast %cst_26 : f32 to vector<8x128xf32>
    %109 = arith.addf %108, %107 : vector<8x128xf32>
    %110 = arith.divf %108, %109 : vector<8x128xf32>
    %111 = vector.extract_strided_slice %98 {offsets = [0, 256], sizes = [8, 128], strides = [1, 1]} : vector<8x512xf32> to vector<8x128xf32>
    %112 = math.tanh %111 : vector<8x128xf32>
    %113 = vector.extract_strided_slice %98 {offsets = [0, 384], sizes = [8, 128], strides = [1, 1]} : vector<8x512xf32> to vector<8x128xf32>
    %114 = arith.negf %113 : vector<8x128xf32>
    %115 = math.exp %114 : vector<8x128xf32>
    %cst_27 = arith.constant 1.000000e+00 : f32
    %116 = vector.broadcast %cst_27 : f32 to vector<8x128xf32>
    %117 = arith.addf %116, %115 : vector<8x128xf32>
    %118 = arith.divf %116, %117 : vector<8x128xf32>
    %119 = arith.mulf %110, %93 : vector<8x128xf32>
    %120 = arith.mulf %104, %112 : vector<8x128xf32>
    %121 = arith.addf %119, %120 : vector<8x128xf32>
    %122 = math.tanh %121 : vector<8x128xf32>
    %123 = arith.mulf %118, %122 : vector<8x128xf32>
    %124 = vector.extract_strided_slice %8 {offsets = [32, 0], sizes = [8, 512], strides = [1, 1]} : vector<64x512xf32> to vector<8x512xf32>
    %cst_28 = arith.constant dense<0.000000e+00> : vector<8x512xf32>
    %125 = tpu.matmul %123, %9, %cst_28 {dimension_numbers = #tpu.dot_dimension_numbers<[1], [0], [0], [1], [0, 0, 1, 1], [], []>} : vector<8x128xf32>, vector<128x512xf32>, vector<8x512xf32> -> vector<8x512xf32>
    %126 = arith.addf %124, %125 : vector<8x512xf32>
    %127 = vector.extract_strided_slice %126 {offsets = [0, 0], sizes = [8, 128], strides = [1, 1]} : vector<8x512xf32> to vector<8x128xf32>
    %128 = arith.negf %127 : vector<8x128xf32>
    %129 = math.exp %128 : vector<8x128xf32>
    %cst_29 = arith.constant 1.000000e+00 : f32
    %130 = vector.broadcast %cst_29 : f32 to vector<8x128xf32>
    %131 = arith.addf %130, %129 : vector<8x128xf32>
    %132 = arith.divf %130, %131 : vector<8x128xf32>
    %133 = vector.extract_strided_slice %126 {offsets = [0, 128], sizes = [8, 128], strides = [1, 1]} : vector<8x512xf32> to vector<8x128xf32>
    %134 = arith.negf %133 : vector<8x128xf32>
    %135 = math.exp %134 : vector<8x128xf32>
    %cst_30 = arith.constant 1.000000e+00 : f32
    %136 = vector.broadcast %cst_30 : f32 to vector<8x128xf32>
    %137 = arith.addf %136, %135 : vector<8x128xf32>
    %138 = arith.divf %136, %137 : vector<8x128xf32>
    %139 = vector.extract_strided_slice %126 {offsets = [0, 256], sizes = [8, 128], strides = [1, 1]} : vector<8x512xf32> to vector<8x128xf32>
    %140 = math.tanh %139 : vector<8x128xf32>
    %141 = vector.extract_strided_slice %126 {offsets = [0, 384], sizes = [8, 128], strides = [1, 1]} : vector<8x512xf32> to vector<8x128xf32>
    %142 = arith.negf %141 : vector<8x128xf32>
    %143 = math.exp %142 : vector<8x128xf32>
    %cst_31 = arith.constant 1.000000e+00 : f32
    %144 = vector.broadcast %cst_31 : f32 to vector<8x128xf32>
    %145 = arith.addf %144, %143 : vector<8x128xf32>
    %146 = arith.divf %144, %145 : vector<8x128xf32>
    %147 = arith.mulf %138, %121 : vector<8x128xf32>
    %148 = arith.mulf %132, %140 : vector<8x128xf32>
    %149 = arith.addf %147, %148 : vector<8x128xf32>
    %150 = math.tanh %149 : vector<8x128xf32>
    %151 = arith.mulf %146, %150 : vector<8x128xf32>
    %152 = vector.extract_strided_slice %8 {offsets = [40, 0], sizes = [8, 512], strides = [1, 1]} : vector<64x512xf32> to vector<8x512xf32>
    %cst_32 = arith.constant dense<0.000000e+00> : vector<8x512xf32>
    %153 = tpu.matmul %151, %9, %cst_32 {dimension_numbers = #tpu.dot_dimension_numbers<[1], [0], [0], [1], [0, 0, 1, 1], [], []>} : vector<8x128xf32>, vector<128x512xf32>, vector<8x512xf32> -> vector<8x512xf32>
    %154 = arith.addf %152, %153 : vector<8x512xf32>
    %155 = vector.extract_strided_slice %154 {offsets = [0, 0], sizes = [8, 128], strides = [1, 1]} : vector<8x512xf32> to vector<8x128xf32>
    %156 = arith.negf %155 : vector<8x128xf32>
    %157 = math.exp %156 : vector<8x128xf32>
    %cst_33 = arith.constant 1.000000e+00 : f32
    %158 = vector.broadcast %cst_33 : f32 to vector<8x128xf32>
    %159 = arith.addf %158, %157 : vector<8x128xf32>
    %160 = arith.divf %158, %159 : vector<8x128xf32>
    %161 = vector.extract_strided_slice %154 {offsets = [0, 128], sizes = [8, 128], strides = [1, 1]} : vector<8x512xf32> to vector<8x128xf32>
    %162 = arith.negf %161 : vector<8x128xf32>
    %163 = math.exp %162 : vector<8x128xf32>
    %cst_34 = arith.constant 1.000000e+00 : f32
    %164 = vector.broadcast %cst_34 : f32 to vector<8x128xf32>
    %165 = arith.addf %164, %163 : vector<8x128xf32>
    %166 = arith.divf %164, %165 : vector<8x128xf32>
    %167 = vector.extract_strided_slice %154 {offsets = [0, 256], sizes = [8, 128], strides = [1, 1]} : vector<8x512xf32> to vector<8x128xf32>
    %168 = math.tanh %167 : vector<8x128xf32>
    %169 = vector.extract_strided_slice %154 {offsets = [0, 384], sizes = [8, 128], strides = [1, 1]} : vector<8x512xf32> to vector<8x128xf32>
    %170 = arith.negf %169 : vector<8x128xf32>
    %171 = math.exp %170 : vector<8x128xf32>
    %cst_35 = arith.constant 1.000000e+00 : f32
    %172 = vector.broadcast %cst_35 : f32 to vector<8x128xf32>
    %173 = arith.addf %172, %171 : vector<8x128xf32>
    %174 = arith.divf %172, %173 : vector<8x128xf32>
    %175 = arith.mulf %166, %149 : vector<8x128xf32>
    %176 = arith.mulf %160, %168 : vector<8x128xf32>
    %177 = arith.addf %175, %176 : vector<8x128xf32>
    %178 = math.tanh %177 : vector<8x128xf32>
    %179 = arith.mulf %174, %178 : vector<8x128xf32>
    %180 = vector.extract_strided_slice %8 {offsets = [48, 0], sizes = [8, 512], strides = [1, 1]} : vector<64x512xf32> to vector<8x512xf32>
    %cst_36 = arith.constant dense<0.000000e+00> : vector<8x512xf32>
    %181 = tpu.matmul %179, %9, %cst_36 {dimension_numbers = #tpu.dot_dimension_numbers<[1], [0], [0], [1], [0, 0, 1, 1], [], []>} : vector<8x128xf32>, vector<128x512xf32>, vector<8x512xf32> -> vector<8x512xf32>
    %182 = arith.addf %180, %181 : vector<8x512xf32>
    %183 = vector.extract_strided_slice %182 {offsets = [0, 0], sizes = [8, 128], strides = [1, 1]} : vector<8x512xf32> to vector<8x128xf32>
    %184 = arith.negf %183 : vector<8x128xf32>
    %185 = math.exp %184 : vector<8x128xf32>
    %cst_37 = arith.constant 1.000000e+00 : f32
    %186 = vector.broadcast %cst_37 : f32 to vector<8x128xf32>
    %187 = arith.addf %186, %185 : vector<8x128xf32>
    %188 = arith.divf %186, %187 : vector<8x128xf32>
    %189 = vector.extract_strided_slice %182 {offsets = [0, 128], sizes = [8, 128], strides = [1, 1]} : vector<8x512xf32> to vector<8x128xf32>
    %190 = arith.negf %189 : vector<8x128xf32>
    %191 = math.exp %190 : vector<8x128xf32>
    %cst_38 = arith.constant 1.000000e+00 : f32
    %192 = vector.broadcast %cst_38 : f32 to vector<8x128xf32>
    %193 = arith.addf %192, %191 : vector<8x128xf32>
    %194 = arith.divf %192, %193 : vector<8x128xf32>
    %195 = vector.extract_strided_slice %182 {offsets = [0, 256], sizes = [8, 128], strides = [1, 1]} : vector<8x512xf32> to vector<8x128xf32>
    %196 = math.tanh %195 : vector<8x128xf32>
    %197 = vector.extract_strided_slice %182 {offsets = [0, 384], sizes = [8, 128], strides = [1, 1]} : vector<8x512xf32> to vector<8x128xf32>
    %198 = arith.negf %197 : vector<8x128xf32>
    %199 = math.exp %198 : vector<8x128xf32>
    %cst_39 = arith.constant 1.000000e+00 : f32
    %200 = vector.broadcast %cst_39 : f32 to vector<8x128xf32>
    %201 = arith.addf %200, %199 : vector<8x128xf32>
    %202 = arith.divf %200, %201 : vector<8x128xf32>
    %203 = arith.mulf %194, %177 : vector<8x128xf32>
    %204 = arith.mulf %188, %196 : vector<8x128xf32>
    %205 = arith.addf %203, %204 : vector<8x128xf32>
    %206 = math.tanh %205 : vector<8x128xf32>
    %207 = arith.mulf %202, %206 : vector<8x128xf32>
    %208 = vector.extract_strided_slice %8 {offsets = [56, 0], sizes = [8, 512], strides = [1, 1]} : vector<64x512xf32> to vector<8x512xf32>
    %cst_40 = arith.constant dense<0.000000e+00> : vector<8x512xf32>
    %209 = tpu.matmul %207, %9, %cst_40 {dimension_numbers = #tpu.dot_dimension_numbers<[1], [0], [0], [1], [0, 0, 1, 1], [], []>} : vector<8x128xf32>, vector<128x512xf32>, vector<8x512xf32> -> vector<8x512xf32>
    %210 = arith.addf %208, %209 : vector<8x512xf32>
    %211 = vector.extract_strided_slice %210 {offsets = [0, 0], sizes = [8, 128], strides = [1, 1]} : vector<8x512xf32> to vector<8x128xf32>
    %212 = arith.negf %211 : vector<8x128xf32>
    %213 = math.exp %212 : vector<8x128xf32>
    %cst_41 = arith.constant 1.000000e+00 : f32
    %214 = vector.broadcast %cst_41 : f32 to vector<8x128xf32>
    %215 = arith.addf %214, %213 : vector<8x128xf32>
    %216 = arith.divf %214, %215 : vector<8x128xf32>
    %217 = vector.extract_strided_slice %210 {offsets = [0, 128], sizes = [8, 128], strides = [1, 1]} : vector<8x512xf32> to vector<8x128xf32>
    %218 = arith.negf %217 : vector<8x128xf32>
    %219 = math.exp %218 : vector<8x128xf32>
    %cst_42 = arith.constant 1.000000e+00 : f32
    %220 = vector.broadcast %cst_42 : f32 to vector<8x128xf32>
    %221 = arith.addf %220, %219 : vector<8x128xf32>
    %222 = arith.divf %220, %221 : vector<8x128xf32>
    %223 = vector.extract_strided_slice %210 {offsets = [0, 256], sizes = [8, 128], strides = [1, 1]} : vector<8x512xf32> to vector<8x128xf32>
    %224 = math.tanh %223 : vector<8x128xf32>
    %225 = vector.extract_strided_slice %210 {offsets = [0, 384], sizes = [8, 128], strides = [1, 1]} : vector<8x512xf32> to vector<8x128xf32>
    %226 = arith.negf %225 : vector<8x128xf32>
    %227 = math.exp %226 : vector<8x128xf32>
    %cst_43 = arith.constant 1.000000e+00 : f32
    %228 = vector.broadcast %cst_43 : f32 to vector<8x128xf32>
    %229 = arith.addf %228, %227 : vector<8x128xf32>
    %230 = arith.divf %228, %229 : vector<8x128xf32>
    %231 = arith.mulf %222, %205 : vector<8x128xf32>
    %232 = arith.mulf %216, %224 : vector<8x128xf32>
    %233 = arith.addf %231, %232 : vector<8x128xf32>
    %234 = math.tanh %233 : vector<8x128xf32>
    %235 = arith.mulf %230, %234 : vector<8x128xf32>
    %c0_44 = arith.constant 0 : index
    %c0_45 = arith.constant 0 : index
    %236 = vector.load %arg6[%c0_44, %c0_45] : memref<8x128xf32, #tpu.memory_space<vmem>>, vector<8x128xf32>
    tpu.vector_store %arg6[%c0_44, %c0_45], %235 {strides = array<i32>} : memref<8x128xf32, #tpu.memory_space<vmem>>, vector<8x128xf32>,
    %c0_46 = arith.constant 0 : index
    %c0_47 = arith.constant 0 : index
    %237 = vector.load %arg7[%c0_46, %c0_47] : memref<8x128xf32, #tpu.memory_space<vmem>>, vector<8x128xf32>
    tpu.vector_store %arg7[%c0_46, %c0_47], %233 {strides = array<i32>} : memref<8x128xf32, #tpu.memory_space<vmem>>, vector<8x128xf32>,
    %c0_i32_48 = arith.constant 0 : i32
    %238 = arith.cmpi eq, %arg0, %c0_i32_48 : i32
    %239 = arith.extui %238 : i1 to i32
    %c0_i32_49 = arith.constant 0 : i32
    %240 = arith.cmpi ne, %239, %c0_i32_49 : i32
    scf.if %240 {
      %c0_50 = arith.constant 0 : index
      %c0_51 = arith.constant 0 : index
      %241 = vector.load %arg5[%c0_50, %c0_51] : memref<8x128xf32, #tpu.memory_space<vmem>>, vector<8x128xf32>
      tpu.vector_store %arg5[%c0_50, %c0_51], %235 {strides = array<i32>} : memref<8x128xf32, #tpu.memory_space<vmem>>, vector<8x128xf32>,
    } else {
    }
    return
  }
  func.func @transform_0(%arg0: i32) -> (i32, i32) {
    %c0_i32 = arith.constant 0 : i32
    %c0_i32_0 = arith.constant 0 : i32
    return %arg0, %c0_i32 : i32, i32
  }
  func.func @transform_1(%arg0: i32) -> (i32, i32) {
    %c0_i32 = arith.constant 0 : i32
    %c0_i32_0 = arith.constant 0 : i32
    %c0_i32_1 = arith.constant 0 : i32
    return %c0_i32, %c0_i32_0 : i32, i32
  }
  func.func @transform_2(%arg0: i32) -> (i32, i32) {
    %c0_i32 = arith.constant 0 : i32
    %c0_i32_0 = arith.constant 0 : i32
    %c0_i32_1 = arith.constant 0 : i32
    return %c0_i32, %c0_i32_0 : i32, i32
  }
  func.func @transform_3(%arg0: i32) -> (i32, i32) {
    %c0_i32 = arith.constant 0 : i32
    %c0_i32_0 = arith.constant 0 : i32
    %c0_i32_1 = arith.constant 0 : i32
    return %c0_i32, %c0_i32_0 : i32, i32
  }
  func.func @transform_4(%arg0: i32) -> (i32, i32) {
    %c0_i32 = arith.constant 0 : i32
    %c0_i32_0 = arith.constant 0 : i32
    %c0_i32_1 = arith.constant 0 : i32
    return %c0_i32, %c0_i32_0 : i32, i32
  }
}

</mosaic_0001>

<bundles_post_ra>
// kernel: tpu_custom_call.1
= control target key start
LH: loop header
LB: loop body
LE: loop exit
PB: predicated region body
PF: predicated region fallthrough
CT: control target
= control target key end

     0   :  { %9 = vsyncpa [#allocation5], 0  ;;  %s3160_s0 = inlined_call_operand.hbm [shape: f32[64,64], index: 0, kind: input, shape index: {}]   ;;  %s3161_s1 = inlined_call_operand.hbm [shape: f32[64,512], index: 1, kind: input, shape index: {}]   ;;  %s3162_s2 = inlined_call_operand.hbm [shape: f32[128,512], index: 2, kind: input, shape index: {}]   ;;  %s3163_s3 = inlined_call_operand.vmem [shape: f32[1,512], index: 3, kind: input, shape index: {}]   ;;  %s3164_s4 = inlined_call_operand.hbm [shape: f32[8,128], index: 4, kind: output, shape index: {}]  }
   0x1   :  { %10 = vsyncpa [#allocation8], 0 }
   0x2   :  { %11 = vsyncpa [#allocation6], 0  ;;  %s2153_s15 = smov [#allocation7]  }
   0x3   :  { %s29_s16 = sshll.u32 %s2153_s15, 4  ;;  %s30_s16 = int_to_ptr.vmem [resolvable:$true] %s29_s16 }
   0x4   :  { %s2075_s17 = scalar_lea.vmem %s30_s16, 4096  ;;  %p2080_p1 = scmp.lt.s32.totalorder %s30_s16, %s30_s16 }
   0x5   :  { %p2076_p0 = scmp.ne.s32.totalorder %s30_s16, %s2075_s17  ;;  %p2081_p2 = scmp.lt.s32.totalorder %s2075_s17, %s2075_s17 }
   0x7   :  { %p2082_p3 = por %p2081_p2, %p2080_p1 }
   0x9   :  { %p2083_p4 = pnand %p2082_p3, %p2076_p0 }
   0xb   :  { %2086 = shalt.err (!%p2083_p4)
}
   0xc   :  { %s2154_s18 = smov 512   ;;  %s2155_s19 = smov 32  }
   0xd   :  { %35 = dma.hbm_to_vmem [thread:$0]  %s3161_s1, 4096, %s30_s16, [#allocation8], %s2154_s18, %s2154_s18, %s2155_s19  }
   0xe   :  { %s2156_s22 = smov [#allocation4]  }
   0xf   :  { %s17_s23 = sshll.u32 %s2156_s22, 4  ;;  %s18_s23 = int_to_ptr.vmem [resolvable:$true] %s17_s23 }
  0x10   :  { %s2095_s24 = scalar_lea.vmem %s18_s23, 1024  ;;  %p2100_p6 = scmp.lt.s32.totalorder %s18_s23, %s18_s23 }
  0x11   :  { %p2096_p5 = scmp.ne.s32.totalorder %s18_s23, %s2095_s24  ;;  %p2101_p7 = scmp.lt.s32.totalorder %s2095_s24, %s2095_s24 }
  0x13   :  { %p2102_p8 = por %p2101_p7, %p2100_p6 }
  0x15   :  { %p2103_p9 = pnand %p2102_p8, %p2096_p5 }
  0x17   :  { %2106 = shalt.err (!%p2103_p9)
}
  0x18   :  { %s2157_s25 = smov 128   ;;  %s2158_s26 = smov 8  }
  0x19   :  { %23 = dma.hbm_to_vmem [thread:$0]  %s3160_s0, 1024, %s18_s23, [#allocation5], %s2157_s25, %s2157_s25, %s2158_s26  }
  0x1a   :  { %s2159_s29 = smov [#allocation9]  }
  0x1b   :  { %s41_s30 = sshll.u32 %s2159_s29, 4  ;;  %s42_s30 = int_to_ptr.vmem [resolvable:$true] %s41_s30 }
  0x1c   :  { %s2115_s1 = scalar_lea.vmem %s42_s30, 8192  ;;  %p2120_p11 = scmp.lt.s32.totalorder %s42_s30, %s42_s30 }
  0x1d   :  { %p2116_p10 = scmp.ne.s32.totalorder %s42_s30, %s2115_s1  ;;  %p2121_p12 = scmp.lt.s32.totalorder %s2115_s1, %s2115_s1 }
  0x1f   :  { %p2122_p13 = por %p2121_p12, %p2120_p11 }
  0x21   :  { %p2123_p0 = pnand %p2122_p13, %p2116_p10 }
  0x23   :  { %2126 = shalt.err (!%p2123_p0)
}
  0x24   :  { %47 = dma.hbm_to_vmem [thread:$0]  %s3162_s2, 8192, %s42_s30, [#allocation8], %s2154_s18, %s2154_s18, %s2155_s19  }
  0x25   :  { %2147 = dma.done.wait [#allocation5], 1024  }
  0x26   :  { %2148 = vsyncadd [#allocation5], 4294966272 }
  0x27   :  { %2149 = dma.done.wait [#allocation8], 12288  }
  0x28   :  { %2150 = vsyncadd [#allocation8], 4294955008  ;;  %v3165_v0 = vmov 0.0   ;;  %v102_v1 = vld [vmem:[#allocation7 + $0xe8] sm:$0xff]  ;;  %v104_v2 = vld [vmem:[#allocation7 + $0xf8] sm:$0xff]  ;;  %vm127_vm0 = vcmask 523264  }
  0x29   :  { %216 = vmatprep.mubr.f32.mxu0 %v3165_v0  ;;  %329 = vmatprep.mubr.f32.mxu1 %v3165_v0  ;;  %v101_v3 = vld [vmem:[#allocation7 + $0xe0] sm:$0xff]  ;;  %v103_v4 = vld [vmem:[#allocation7 + $0xf0] sm:$0xff]  ;;  %v98_v5 = vld [vmem:[#allocation7 + $0xc8] sm:$0xff] }
  0x2a   :  { %168 = vmatprep.subr.mxu0 %v102_v1  ;;  %281 = vmatprep.subr.mxu1 %v104_v2  ;;  %v100_v6 = vld [vmem:[#allocation7 + $0xd8] sm:$0xff]  ;;  %v97_v7 = vld [vmem:[#allocation7 + $0xc0] sm:$0xff]  ;;  %v99_v8 = vld [vmem:[#allocation7 + $0xd0] sm:$0xff] }
  0x2b   :  { %169 = vmatpush1.msra.mxu0 %v101_v3  ;;  %282 = vmatpush1.msra.mxu1 %v103_v4  ;;  %v94_v9 = vld [vmem:[#allocation7 + $0xa8] sm:$0xff]  ;;  %v96_v10 = vld [vmem:[#allocation7 + $0xb8] sm:$0xff]  ;;  %v93_v11 = vld [vmem:[#allocation7 + $0xa0] sm:$0xff] }
  0x2c   :  { %170 = vmatprep.subr.mxu0 %v98_v5  ;;  %283 = vmatprep.subr.mxu1 %v100_v6  ;;  %v95_v12 = vld [vmem:[#allocation7 + $0xb0] sm:$0xff]  ;;  %v90_v13 = vld [vmem:[#allocation7 + $0x88] sm:$0xff]  ;;  %v92_v14 = vld [vmem:[#allocation7 + $0x98] sm:$0xff] }
  0x2d   :  { %171 = vmatpush1.msra.mxu0 %v97_v7  ;;  %284 = vmatpush1.msra.mxu1 %v99_v8  ;;  %v89_v15 = vld [vmem:[#allocation7 + $0x80] sm:$0xff]  ;;  %v91_v16 = vld [vmem:[#allocation7 + $0x90] sm:$0xff]  ;;  %v86_v17 = vld [vmem:[#allocation7 + $0x68] sm:$0xff] }
  0x2e   :  { %172 = vmatprep.subr.mxu0 %v94_v9  ;;  %285 = vmatprep.subr.mxu1 %v96_v10  ;;  %v88_v18 = vld [vmem:[#allocation7 + $0x78] sm:$0xff]  ;;  %v85_v19 = vld [vmem:[#allocation7 + $0x60] sm:$0xff]  ;;  %v87_v20 = vld [vmem:[#allocation7 + $0x70] sm:$0xff] }
  0x2f   :  { %173 = vmatpush1.msra.mxu0 %v93_v11  ;;  %286 = vmatpush1.msra.mxu1 %v95_v12  ;;  %v82_v21 = vld [vmem:[#allocation7 + $0x48] sm:$0xff]  ;;  %v84_v22 = vld [vmem:[#allocation7 + $0x58] sm:$0xff]  ;;  %v81_v23 = vld [vmem:[#allocation7 + $0x40] sm:$0xff] }
  0x30   :  { %174 = vmatprep.subr.mxu0 %v90_v13  ;;  %287 = vmatprep.subr.mxu1 %v92_v14  ;;  %v83_v24 = vld [vmem:[#allocation7 + $0x50] sm:$0xff]  ;;  %v78_v25 = vld [vmem:[#allocation7 + $0x28] sm:$0xff]  ;;  %v80_v26 = vld [vmem:[#allocation7 + $0x38] sm:$0xff] }
  0x31   :  { %175 = vmatpush1.msra.mxu0 %v89_v15  ;;  %288 = vmatpush1.msra.mxu1 %v91_v16  ;;  %v77_v27 = vld [vmem:[#allocation7 + $0x20] sm:$0xff]  ;;  %v79_v28 = vld [vmem:[#allocation7 + $0x30] sm:$0xff]  ;;  %v74_v29 = vld [vmem:[#allocation7 + $0x8] sm:$0xff] }
  0x32   :  { %176 = vmatprep.subr.mxu0 %v86_v17  ;;  %289 = vmatprep.subr.mxu1 %v88_v18  ;;  %v76_v30 = vld [vmem:[#allocation7 + $0x18] sm:$0xff]  ;;  %v73_v31 = vld [vmem:[#allocation7] sm:$0xff]  ;;  %v75_v32 = vld [vmem:[#allocation7 + $0x10] sm:$0xff] }
  0x33   :  { %177 = vmatpush1.msra.mxu0 %v85_v19  ;;  %290 = vmatpush1.msra.mxu1 %v87_v20  ;;  %v65_v33 = vld [vmem:[#allocation4] sm:$0xff]  ;;  %v2198_v34 = vld [vmem:[#allocation9 + $0x1e8] sm:$0xff]  ;;  %v2200_v35 = vld [vmem:[#allocation9 + $0x1f8] sm:$0xff] }
  0x34   :  { %178 = vmatprep.subr.mxu0 %v82_v21  ;;  %291 = vmatprep.subr.mxu1 %v84_v22  ;;  %3253 = vst [vmem:[#allocation14_spill] sm:$0xff] %v2198_v34  ;;  %3254 = vst [vmem:[#allocation15_spill] sm:$0xff] %v2200_v35  ;;  %v2202_v36 = vld [vmem:[#allocation9 + $0x1e0] sm:$0xff]  ;;  %v2204_v37 = vld [vmem:[#allocation9 + $0x1f0] sm:$0xff] }
  0x35   :  { %179 = vmatpush1.msra.mxu0 %v81_v23  ;;  %292 = vmatpush1.msra.mxu1 %v83_v24  ;;  %v2208_v38 = vld [vmem:[#allocation9 + $0x1c8] sm:$0xff]  ;;  %v2210_v39 = vld [vmem:[#allocation9 + $0x1d8] sm:$0xff]  ;;  %v2216_v40 = vld [vmem:[#allocation9 + $0x1c0] sm:$0xff] }
  0x36   :  { %180 = vmatprep.subr.mxu0 %v78_v25  ;;  %293 = vmatprep.subr.mxu1 %v80_v26  ;;  %v2218_v41 = vld [vmem:[#allocation9 + $0x1d0] sm:$0xff]  ;;  %v66_v42 = vld [vmem:[#allocation4 + $0x8] sm:$0xff]  ;;  %v2226_v44 = vld [vmem:[#allocation9 + $0x1b8] sm:$0xff] }
  0x37   :  { %181 = vmatpush1.msra.mxu0 %v77_v27  ;;  %294 = vmatpush1.msra.mxu1 %v79_v28  ;;  %v2224_v43 = vld [vmem:[#allocation9 + $0x1a8] sm:$0xff]  ;;  %v2230_v45 = vld [vmem:[#allocation9 + $0x1a0] sm:$0xff]  ;;  %v2232_v46 = vld [vmem:[#allocation9 + $0x1b0] sm:$0xff] }
  0x38   :  { %182 = vmatprep.subr.mxu0 %v74_v29  ;;  %295 = vmatprep.subr.mxu1 %v76_v30  ;;  %v2236_v47 = vld [vmem:[#allocation9 + $0x188] sm:$0xff]  ;;  %v2238_v48 = vld [vmem:[#allocation9 + $0x198] sm:$0xff]  ;;  %v2244_v49 = vld [vmem:[#allocation9 + $0x180] sm:$0xff] }
  0x39   :  { %183 = vmatpush1.msra.mxu0 %v73_v31  ;;  %296 = vmatpush1.msra.mxu1 %v75_v32  ;;  %v2246_v50 = vld [vmem:[#allocation9 + $0x190] sm:$0xff]  ;;  %v2252_v52 = vld [vmem:[#allocation9 + $0x168] sm:$0xff]  ;;  %v2254_v53 = vld [vmem:[#allocation9 + $0x178] sm:$0xff] }
  0x3a   :  { %1826 = vmatmul.mubr.msk.f32.vlgmr.msra.gmra.mxu0 %vm127_vm0, %v65_v33  ;;  %1834 = vmatmul.mubr.msk.f32.vlgmr.msra.gmra.mxu1 %vm127_vm0, %v65_v33  ;;  %v67_v51 = vld [vmem:[#allocation4 + $0x10] sm:$0xff]  ;;  %v2258_v54 = vld [vmem:[#allocation9 + $0x160] sm:$0xff]  ;;  %v2264_v56 = vld [vmem:[#allocation9 + $0x148] sm:$0xff] }
  0x3b   :  { %444 = vmatprep.subr.mxu0 %v2198_v34  ;;  %515 = vmatprep.subr.mxu1 %v2200_v35  ;;  %v2260_v55 = vld [vmem:[#allocation9 + $0x170] sm:$0xff]  ;;  %v2266_v57 = vld [vmem:[#allocation9 + $0x158] sm:$0xff]  ;;  %v2272_v58 = vld [vmem:[#allocation9 + $0x140] sm:$0xff] }
  0x3c   :  { %445 = vmatpush1.msra.mxu0 %v2202_v36  ;;  %516 = vmatpush1.msra.mxu1 %v2204_v37  ;;  %v2274_v59 = vld [vmem:[#allocation9 + $0x150] sm:$0xff]  ;;  %v68_v60 = vld [vmem:[#allocation4 + $0x18] sm:$0xff]  ;;  %v2280_v61 = vld [vmem:[#allocation9 + $0x128] sm:$0xff] }
  0x3d   :  { %446 = vmatprep.subr.mxu0 %v2208_v38  ;;  %517 = vmatprep.subr.mxu1 %v2210_v39  ;;  %v2282_v62 = vld [vmem:[#allocation9 + $0x138] sm:$0xff]  ;;  %v2286_v63 = vld [vmem:[#allocation9 + $0x120] sm:$0xff]  ;;  %v2288_v1 = vld [vmem:[#allocation9 + $0x130] sm:$0xff] }
  0x3e   :  { %222 = vmatprep.mubr.f32.mxu0 %v3165_v0  ;;  %335 = vmatprep.mubr.f32.mxu1 %v3165_v0  ;;  %v2292_v2 = vld [vmem:[#allocation9 + $0x108] sm:$0xff]  ;;  %v2294_v3 = vld [vmem:[#allocation9 + $0x118] sm:$0xff]  ;;  %v2300_v4 = vld [vmem:[#allocation9 + $0x100] sm:$0xff] }
  0x3f   :  { %447 = vmatpush1.msra.mxu0 %v2216_v40  ;;  %518 = vmatpush1.msra.mxu1 %v2218_v41  ;;  %v2302_v5 = vld [vmem:[#allocation9 + $0x110] sm:$0xff]  ;;  %v69_v6 = vld [vmem:[#allocation4 + $0x20] sm:$0xff]  ;;  %v2308_v7 = vld [vmem:[#allocation9 + $0xe8] sm:$0xff] }
  0x40   :  { %1827 = vmatmul.mubr.msk.f32.gmra.mxu0 %vm127_vm0, %v66_v42  ;;  %1835 = vmatmul.mubr.msk.f32.gmra.mxu1 %vm127_vm0, %v66_v42  ;;  %v2310_v8 = vld [vmem:[#allocation9 + $0xf8] sm:$0xff]  ;;  %v2314_v9 = vld [vmem:[#allocation9 + $0xe0] sm:$0xff]  ;;  %v2316_v10 = vld [vmem:[#allocation9 + $0xf0] sm:$0xff] }
  0x41   :  { %448 = vmatprep.subr.mxu0 %v2224_v43  ;;  %519 = vmatprep.subr.mxu1 %v2226_v44  ;;  %v2320_v11 = vld [vmem:[#allocation9 + $0xc8] sm:$0xff]  ;;  %v2322_v12 = vld [vmem:[#allocation9 + $0xd8] sm:$0xff]  ;;  %v2328_v13 = vld [vmem:[#allocation9 + $0xc0] sm:$0xff] }
  0x42   :  { %449 = vmatpush1.msra.mxu0 %v2230_v45  ;;  %520 = vmatpush1.msra.mxu1 %v2232_v46  ;;  %v2330_v14 = vld [vmem:[#allocation9 + $0xd0] sm:$0xff]  ;;  %v70_v15 = vld [vmem:[#allocation4 + $0x28] sm:$0xff]  ;;  %v2338_v17 = vld [vmem:[#allocation9 + $0xb8] sm:$0xff] }
  0x43   :  { %450 = vmatprep.subr.mxu0 %v2236_v47  ;;  %521 = vmatprep.subr.mxu1 %v2238_v48  ;;  %v2336_v16 = vld [vmem:[#allocation9 + $0xa8] sm:$0xff]  ;;  %v2342_v18 = vld [vmem:[#allocation9 + $0xa0] sm:$0xff]  ;;  %v2344_v19 = vld [vmem:[#allocation9 + $0xb0] sm:$0xff] }
  0x44   :  { %228 = vmatprep.mubr.f32.mxu0 %v3165_v0  ;;  %341 = vmatprep.mubr.f32.mxu1 %v3165_v0  ;;  %v2348_v20 = vld [vmem:[#allocation9 + $0x88] sm:$0xff]  ;;  %v2350_v21 = vld [vmem:[#allocation9 + $0x98] sm:$0xff]  ;;  %v2356_v22 = vld [vmem:[#allocation9 + $0x80] sm:$0xff] }
  0x45   :  { %451 = vmatpush1.msra.mxu0 %v2244_v49  ;;  %522 = vmatpush1.msra.mxu1 %v2246_v50  ;;  %3255 = vst [vmem:[#allocation16_spill] sm:$0xff] %v2348_v20  ;;  %3256 = vst [vmem:[#allocation17_spill] sm:$0xff] %v2350_v21  ;;  %v2358_v23 = vld [vmem:[#allocation9 + $0x90] sm:$0xff]  ;;  %v2364_v25 = vld [vmem:[#allocation9 + $0x68] sm:$0xff] }
  0x46   :  { %1828 = vmatmul.mubr.msk.f32.gmra.mxu0 %vm127_vm0, %v67_v51  ;;  %1836 = vmatmul.mubr.msk.f32.gmra.mxu1 %vm127_vm0, %v67_v51  ;;  %3257 = vst [vmem:[#allocation18_spill] sm:$0xff] %v2356_v22  ;;  %3258 = vst [vmem:[#allocation19_spill] sm:$0xff] %v2358_v23  ;;  %v71_v24 = vld [vmem:[#allocation4 + $0x30] sm:$0xff]  ;;  %v2366_v26 = vld [vmem:[#allocation9 + $0x78] sm:$0xff] }
  0x47   :  { %452 = vmatprep.subr.mxu0 %v2252_v52  ;;  %523 = vmatprep.subr.mxu1 %v2254_v53  ;;  %3259 = vst [vmem:[#allocation20_spill] sm:$0xff] %v2364_v25  ;;  %3260 = vst [vmem:[#allocation21_spill] sm:$0xff] %v2366_v26  ;;  %v2370_v27 = vld [vmem:[#allocation9 + $0x60] sm:$0xff]  ;;  %v2372_v28 = vld [vmem:[#allocation9 + $0x70] sm:$0xff] }
  0x48   :  { %453 = vmatpush1.msra.mxu0 %v2258_v54  ;;  %524 = vmatpush1.msra.mxu1 %v2260_v55  ;;  %3261 = vst [vmem:[#allocation22_spill] sm:$0xff] %v2370_v27  ;;  %3262 = vst [vmem:[#allocation23_spill] sm:$0xff] %v2372_v28  ;;  %v2376_v29 = vld [vmem:[#allocation9 + $0x48] sm:$0xff]  ;;  %v2378_v30 = vld [vmem:[#allocation9 + $0x58] sm:$0xff] }
  0x49   :  { %454 = vmatprep.subr.mxu0 %v2264_v56  ;;  %525 = vmatprep.subr.mxu1 %v2266_v57  ;;  %3263 = vst [vmem:[#allocation24_spill] sm:$0xff] %v2376_v29  ;;  %3264 = vst [vmem:[#allocation25_spill] sm:$0xff] %v2378_v30  ;;  %v2384_v31 = vld [vmem:[#allocation9 + $0x40] sm:$0xff]  ;;  %v2386_v32 = vld [vmem:[#allocation9 + $0x50] sm:$0xff] }
  0x4a   :  { %234 = vmatprep.mubr.f32.mxu0 %v3165_v0  ;;  %347 = vmatprep.mubr.f32.mxu1 %v3165_v0  ;;  %3265 = vst [vmem:[#allocation26_spill] sm:$0xff] %v2384_v31  ;;  %3266 = vst [vmem:[#allocation27_spill] sm:$0xff] %v2386_v32  ;;  %v72_v33 = vld [vmem:[#allocation4 + $0x38] sm:$0xff]  ;;  %v2392_v42 = vld [vmem:[#allocation9 + $0x28] sm:$0xff] }
  0x4b   :  { %455 = vmatpush1.msra.mxu0 %v2272_v58  ;;  %526 = vmatpush1.msra.mxu1 %v2274_v59  ;;  %3267 = vst [vmem:[#allocation28_spill] sm:$0xff] %v2392_v42  ;;  %v2394_v51 = vld [vmem:[#allocation9 + $0x38] sm:$0xff] }
  0x4c   :  { %1829 = vmatmul.mubr.msk.f32.gmra.mxu0 %vm127_vm0, %v68_v60  ;;  %1837 = vmatmul.mubr.msk.f32.gmra.mxu1 %vm127_vm0, %v68_v60  ;;  %3268 = vst [vmem:[#allocation29_spill] sm:$0xff] %v2394_v51  ;;  %v2398_v60 = vld [vmem:[#allocation9 + $0x20] sm:$0xff] }
  0x4d   :  { %456 = vmatprep.subr.mxu0 %v2280_v61  ;;  %527 = vmatprep.subr.mxu1 %v2282_v62  ;;  %3269 = vst [vmem:[#allocation30_spill] sm:$0xff] %v2398_v60 }
  0x4e   :  { %457 = vmatpush1.msra.mxu0 %v2286_v63  ;;  %528 = vmatpush1.msra.mxu1 %v2288_v1 }
  0x4f   :  { %458 = vmatprep.subr.mxu0 %v2292_v2  ;;  %529 = vmatprep.subr.mxu1 %v2294_v3 }
  0x50   :  { %240 = vmatprep.mubr.f32.mxu0 %v3165_v0  ;;  %353 = vmatprep.mubr.f32.mxu1 %v3165_v0 }
  0x51   :  { %459 = vmatpush1.msra.mxu0 %v2300_v4  ;;  %530 = vmatpush1.msra.mxu1 %v2302_v5 }
  0x52   :  { %1830 = vmatmul.mubr.msk.f32.gmra.mxu0 %vm127_vm0, %v69_v6  ;;  %1838 = vmatmul.mubr.msk.f32.gmra.mxu1 %vm127_vm0, %v69_v6  ;;  %v2400_v6 = vld [vmem:[#allocation9 + $0x30] sm:$0xff] }
  0x53   :  { %460 = vmatprep.subr.mxu0 %v2308_v7  ;;  %531 = vmatprep.subr.mxu1 %v2310_v8  ;;  %3270 = vst [vmem:[#allocation31_spill] sm:$0xff] %v2400_v6 }
  0x54   :  { %461 = vmatpush1.msra.mxu0 %v2314_v9  ;;  %532 = vmatpush1.msra.mxu1 %v2316_v10 }
  0x55   :  { %462 = vmatprep.subr.mxu0 %v2320_v11  ;;  %533 = vmatprep.subr.mxu1 %v2322_v12 }
  0x56   :  { %246 = vmatprep.mubr.f32.mxu0 %v3165_v0  ;;  %359 = vmatprep.mubr.f32.mxu1 %v3165_v0 }
  0x57   :  { %463 = vmatpush1.msra.mxu0 %v2328_v13  ;;  %534 = vmatpush1.msra.mxu1 %v2330_v14 }
  0x58   :  { %1831 = vmatmul.mubr.msk.f32.gmra.mxu0 %vm127_vm0, %v70_v15  ;;  %1839 = vmatmul.mubr.msk.f32.gmra.mxu1 %vm127_vm0, %v70_v15  ;;  %v2404_v15 = vld [vmem:[#allocation9 + $0x8] sm:$0xff] }
  0x59   :  { %464 = vmatprep.subr.mxu0 %v2336_v16  ;;  %535 = vmatprep.subr.mxu1 %v2338_v17  ;;  %3271 = vst [vmem:[#allocation32_spill] sm:$0xff] %v2404_v15 }
  0x5a   :  { %465 = vmatpush1.msra.mxu0 %v2342_v18  ;;  %536 = vmatpush1.msra.mxu1 %v2344_v19 }
  0x5b   :  { %466 = vmatprep.subr.mxu0 %v2348_v20  ;;  %537 = vmatprep.subr.mxu1 %v2350_v21 }
  0x5c   :  { %252 = vmatprep.mubr.f32.mxu0 %v3165_v0  ;;  %365 = vmatprep.mubr.f32.mxu1 %v3165_v0 }
  0x5d   :  { %467 = vmatpush1.msra.mxu0 %v2356_v22  ;;  %538 = vmatpush1.msra.mxu1 %v2358_v23 }
  0x5e   :  { %1832 = vmatmul.mubr.msk.f32.gmra.mxu0 %vm127_vm0, %v71_v24  ;;  %1840 = vmatmul.mubr.msk.f32.gmra.mxu1 %vm127_vm0, %v71_v24  ;;  %v2406_v24 = vld [vmem:[#allocation9 + $0x18] sm:$0xff] }
  0x5f   :  { %468 = vmatprep.subr.mxu0 %v2364_v25  ;;  %539 = vmatprep.subr.mxu1 %v2366_v26  ;;  %3272 = vst [vmem:[#allocation33_spill] sm:$0xff] %v2406_v24 }
  0x60   :  { %469 = vmatpush1.msra.mxu0 %v2370_v27  ;;  %540 = vmatpush1.msra.mxu1 %v2372_v28 }
  0x61   :  { %470 = vmatprep.subr.mxu0 %v2376_v29  ;;  %541 = vmatprep.subr.mxu1 %v2378_v30 }
  0x62   :  { %258 = vmatprep.mubr.f32.mxu0 %v3165_v0  ;;  %371 = vmatprep.mubr.f32.mxu1 %v3165_v0  ;;  %v2410_v0 = vld [vmem:[#allocation9] sm:$0xff] }
  0x63   :  { %471 = vmatpush1.msra.mxu0 %v2384_v31  ;;  %542 = vmatpush1.msra.mxu1 %v2386_v32  ;;  %3273 = vst [vmem:[#allocation34_spill] sm:$0xff] %v2410_v0  ;;  %v2414_v32 = vld [vmem:[#allocation9 + $0x10] sm:$0xff] }
  0x64   :  { %1833 = vmatmul.mubr.msk.f32.gmra.mxu0 %vm127_vm0, %v72_v33  ;;  %1841 = vmatmul.mubr.msk.f32.gmra.mxu1 %vm127_vm0, %v72_v33  ;;  %3274 = vst [vmem:[#allocation35_spill] sm:$0xff] %v2414_v32  ;;  %v3275_v33 = vmov 0.0  }
  0x65   :  { %472 = vmatprep.subr.mxu0 %v2392_v42  ;;  %543 = vmatprep.subr.mxu1 %v2394_v51 }
  0x66   :  { %473 = vmatpush1.msra.mxu0 %v2398_v60  ;;  %544 = vmatpush1.msra.mxu1 %v2400_v6 }
  0x67   :  { %474 = vmatprep.subr.mxu0 %v2404_v15  ;;  %545 = vmatprep.subr.mxu1 %v2406_v24 }
  0x68   :  { %475 = vmatpush1.msra.mxu0 %v2410_v0  ;;  %508 = vmatprep.mubr.f32.mxu0 %v3275_v33 }
  0x69   :  { %546 = vmatpush1.msra.mxu1 %v2414_v32  ;;  %579 = vmatprep.mubr.f32.mxu1 %v3275_v33 }
  0x6a   :  { %509 = vmatmul.mubr.f32.vlgmr.msra.gmra.mxu0 %v3275_v33  ;;  %580 = vmatmul.mubr.f32.vlgmr.msra.gmra.mxu1 %v3275_v33 }
  0x6b   :  { %614 = vmatprep.subr.mxu0 %v2198_v34  ;;  %685 = vmatprep.subr.mxu1 %v2200_v35 }
  0x6c   :  { %615 = vmatpush1.msra.mxu0 %v2202_v36  ;;  %686 = vmatpush1.msra.mxu1 %v2204_v37 }
  0x6d   :  { %616 = vmatprep.subr.mxu0 %v2208_v38  ;;  %687 = vmatprep.subr.mxu1 %v2210_v39 }
  0x6e   :  { %617 = vmatpush1.msra.mxu0 %v2216_v40  ;;  %688 = vmatpush1.msra.mxu1 %v2218_v41 }
  0x6f   :  { %618 = vmatprep.subr.mxu0 %v2224_v43  ;;  %689 = vmatprep.subr.mxu1 %v2226_v44 }
  0x70   :  { %619 = vmatpush1.msra.mxu0 %v2230_v45  ;;  %690 = vmatpush1.msra.mxu1 %v2232_v46 }
  0x71   :  { %620 = vmatprep.subr.mxu0 %v2236_v47  ;;  %691 = vmatprep.subr.mxu1 %v2238_v48 }
  0x72   :  { %621 = vmatpush1.msra.mxu0 %v2244_v49  ;;  %692 = vmatpush1.msra.mxu1 %v2246_v50 }
  0x73   :  { %622 = vmatprep.subr.mxu0 %v2252_v52  ;;  %693 = vmatprep.subr.mxu1 %v2254_v53 }
  0x74   :  { %623 = vmatpush1.msra.mxu0 %v2258_v54  ;;  %694 = vmatpush1.msra.mxu1 %v2260_v55 }
  0x75   :  { %624 = vmatprep.subr.mxu0 %v2264_v56  ;;  %695 = vmatprep.subr.mxu1 %v2266_v57 }
  0x76   :  { %625 = vmatpush1.msra.mxu0 %v2272_v58  ;;  %696 = vmatpush1.msra.mxu1 %v2274_v59 }
  0x77   :  { %626 = vmatprep.subr.mxu0 %v2280_v61  ;;  %697 = vmatprep.subr.mxu1 %v2282_v62 }
  0x78   :  { %627 = vmatpush1.msra.mxu0 %v2286_v63  ;;  %698 = vmatpush1.msra.mxu1 %v2288_v1 }
  0x79   :  { %628 = vmatprep.subr.mxu0 %v2292_v2  ;;  %699 = vmatprep.subr.mxu1 %v2294_v3 }
  0x7a   :  { %629 = vmatpush1.msra.mxu0 %v2300_v4  ;;  %700 = vmatpush1.msra.mxu1 %v2302_v5 }
  0x7b   :  { %630 = vmatprep.subr.mxu0 %v2308_v7  ;;  %701 = vmatprep.subr.mxu1 %v2310_v8 }
  0x7c   :  { %631 = vmatpush1.msra.mxu0 %v2314_v9  ;;  %702 = vmatpush1.msra.mxu1 %v2316_v10 }
  0x7d   :  { %632 = vmatprep.subr.mxu0 %v2320_v11  ;;  %703 = vmatprep.subr.mxu1 %v2322_v12 }
  0x7e   :  { %633 = vmatpush1.msra.mxu0 %v2328_v13  ;;  %704 = vmatpush1.msra.mxu1 %v2330_v14 }
  0x7f   :  { %634 = vmatprep.subr.mxu0 %v2336_v16  ;;  %705 = vmatprep.subr.mxu1 %v2338_v17 }
  0x80   :  { %635 = vmatpush1.msra.mxu0 %v2342_v18  ;;  %706 = vmatpush1.msra.mxu1 %v2344_v19 }
  0x81   :  { %636 = vmatprep.subr.mxu0 %v2348_v20  ;;  %707 = vmatprep.subr.mxu1 %v2350_v21  ;;  %v3276_v20 = vld [vmem:[#allocation27_spill] sm:$0xff] }
  0x82   :  { %637 = vmatpush1.msra.mxu0 %v2356_v22  ;;  %708 = vmatpush1.msra.mxu1 %v2358_v23 }
  0x83   :  { %638 = vmatprep.subr.mxu0 %v2364_v25  ;;  %709 = vmatprep.subr.mxu1 %v2366_v26 }
  0x84   :  { %639 = vmatpush1.msra.mxu0 %v2370_v27  ;;  %710 = vmatpush1.msra.mxu1 %v2372_v28 }
  0x85   :  { %640 = vmatprep.subr.mxu0 %v2376_v29  ;;  %711 = vmatprep.subr.mxu1 %v2378_v30 }
  0x86   :  { %641 = vmatpush1.msra.mxu0 %v2384_v31  ;;  %712 = vmatpush1.msra.mxu1 %v3276_v20 }
  0x87   :  { %642 = vmatprep.subr.mxu0 %v2392_v42  ;;  %713 = vmatprep.subr.mxu1 %v2394_v51  ;;  %v107_v51 = vlaneseq }
  0x88   :  { %643 = vmatpush1.msra.mxu0 %v2398_v60  ;;  %714 = vmatpush1.msra.mxu1 %v2400_v6 }
  0x89   :  { %644 = vmatprep.subr.mxu0 %v2404_v15  ;;  %715 = vmatprep.subr.mxu1 %v2406_v24  ;;  %v108_v60 = vshrl.u32 %v107_v51, 7 }
  0x8a   :  { %645 = vmatpush1.msra.mxu0 %v2410_v0  ;;  %678 = vmatprep.mubr.f32.mxu0 %v3275_v33  ;;  %v105_v0 = vld [vmem:[%s3163_s3] sm:$0xf]  ;;  %s2161_s3 = smov [#allocation10]  }
  0x8b   :  { %716 = vmatpush1.msra.mxu1 %v2414_v32  ;;  %749 = vmatprep.mubr.f32.mxu1 %v3275_v33  ;;  %v109_v15 = vsub.s32 0, %v108_v60  ;;  %v117_v24 = vsub.s32 2, %v108_v60  ;;  %v113_v33 = vsub.s32 1, %v108_v60  ;;  %s1816_s7 = sshll.u32 %s2161_s3, 4  ;;  %s1817_s7 = int_to_ptr.vmem [resolvable:$true] %s1816_s7 }
  0x8c   :  { %784 = vmatprep.subr.mxu0 %v2198_v34  ;;  %855 = vmatprep.subr.mxu1 %v2200_v35  ;;  %v121_v34 = vsub.s32 3, %v108_v60  ;;  %s2127_s8 = scalar_lea.vmem %s1817_s7, 128  ;;  %p2132_p2 = scmp.lt.s32.totalorder %s1817_s7, %s1817_s7 }
  0x8d   :  { %v110_v31 = vrot.slane %v105_v0, %v109_v15  ;;  %v2503_v35 = vrot.slane %v105_v0, %v117_v24  ;;  %v114_v29 = vrot.slane %v105_v0, %v113_v33  ;;  %p2128_p1 = scmp.ne.s32.totalorder %s1817_s7, %s2127_s8  ;;  %p2133_p3 = scmp.lt.s32.totalorder %s2127_s8, %s2127_s8 }
  0x8e   :  { %v2505_v28 = vrot.slane %v105_v0, %v121_v34 }
  0x8f   :  { %p2134_p4 = por %p2133_p3, %p2132_p2 }
  0x91   :  { %p2135_p5 = pnand %p2134_p4, %p2128_p1 }
  0xfa   :  { %v2492_v42 = vpop.f32.mrf.mxu0  ;;  %v2494_v6 = vpop.f32.mrf.mxu1 }
  0xfc   :  { %v2499_v20 = vpop.f32.mrf.mxu0  ;;  %v2501_v32 = vpop.f32.mrf.mxu1 }
 0x100   :  { %v224_v51 = vpop.f32.mrf.mxu0  ;;  %v337_v30 = vpop.f32.mrf.mxu1 }
 0x101   :  { %v2507_v27 = vadd.f32 %v224_v51, %v110_v31  ;;  %v2510_v26 = vadd.f32 %v337_v30, %v2503_v35 }
 0x102   :  { %v226_v25 = vpop.f32.mrf.mxu0  ;;  %v339_v23 = vpop.f32.mrf.mxu1 }
 0x103   :  { %3277 = vst [vmem:[#allocation36_spill] sm:$0xff] %v2507_v27  ;;  %3278 = vst [vmem:[#allocation37_spill] sm:$0xff] %v2510_v26  ;;  %v2512_v22 = vadd.f32 %v226_v25, %v114_v29  ;;  %v2515_v21 = vadd.f32 %v339_v23, %v2505_v28 }
 0x105   :  { %3279 = vst [vmem:[#allocation38_spill] sm:$0xff] %v2512_v22  ;;  %3280 = vst [vmem:[#allocation39_spill] sm:$0xff] %v2515_v21 }
 0x106   :  { %v230_v60 = vpop.f32.mrf.mxu0  ;;  %v343_v15 = vpop.f32.mrf.mxu1 }
 0x107   :  { %v2517_v24 = vadd.f32 %v230_v60, %v110_v31  ;;  %v2520_v33 = vadd.f32 %v343_v15, %v2503_v35 }
 0x108   :  { %v232_v0 = vpop.f32.mrf.mxu0  ;;  %v345_v34 = vpop.f32.mrf.mxu1 }
 0x109   :  { %3281 = vst [vmem:[#allocation40_spill] sm:$0xff] %v2517_v24  ;;  %3282 = vst [vmem:[#allocation41_spill] sm:$0xff] %v2520_v33  ;;  %v2522_v51 = vadd.f32 %v232_v0, %v114_v29  ;;  %v2525_v30 = vadd.f32 %v345_v34, %v2505_v28 }
 0x10b   :  { %3283 = vst [vmem:[#allocation42_spill] sm:$0xff] %v2522_v51  ;;  %3284 = vst [vmem:[#allocation43_spill] sm:$0xff] %v2525_v30 }
 0x10c   :  { %v236_v26 = vpop.f32.mrf.mxu0  ;;  %v349_v25 = vpop.f32.mrf.mxu1 }
 0x10d   :  { %v2527_v22 = vadd.f32 %v236_v26, %v110_v31  ;;  %v2530_v23 = vadd.f32 %v349_v25, %v2503_v35 }
 0x10e   :  { %v238_v21 = vpop.f32.mrf.mxu0  ;;  %v351_v60 = vpop.f32.mrf.mxu1 }
 0x10f   :  { %3285 = vst [vmem:[#allocation44_spill] sm:$0xff] %v2527_v22  ;;  %3286 = vst [vmem:[#allocation45_spill] sm:$0xff] %v2530_v23  ;;  %v2532_v24 = vadd.f32 %v238_v21, %v114_v29  ;;  %v2535_v15 = vadd.f32 %v351_v60, %v2505_v28 }
 0x111   :  { %3287 = vst [vmem:[#allocation46_spill] sm:$0xff] %v2532_v24  ;;  %3288 = vst [vmem:[#allocation47_spill] sm:$0xff] %v2535_v15 }
 0x112   :  { %v242_v33 = vpop.f32.mrf.mxu0  ;;  %v355_v0 = vpop.f32.mrf.mxu1 }
 0x113   :  { %v2537_v51 = vadd.f32 %v242_v33, %v110_v31  ;;  %v2540_v34 = vadd.f32 %v355_v0, %v2503_v35 }
 0x114   :  { %v244_v30 = vpop.f32.mrf.mxu0  ;;  %v357_v26 = vpop.f32.mrf.mxu1 }
 0x115   :  { %3289 = vst [vmem:[#allocation48_spill] sm:$0xff] %v2537_v51  ;;  %3290 = vst [vmem:[#allocation49_spill] sm:$0xff] %v2540_v34  ;;  %v2542_v22 = vadd.f32 %v244_v30, %v114_v29  ;;  %v2545_v25 = vadd.f32 %v357_v26, %v2505_v28 }
 0x117   :  { %3291 = vst [vmem:[#allocation50_spill] sm:$0xff] %v2542_v22  ;;  %3292 = vst [vmem:[#allocation51_spill] sm:$0xff] %v2545_v25 }
 0x118   :  { %v248_v23 = vpop.f32.mrf.mxu0  ;;  %v361_v21 = vpop.f32.mrf.mxu1 }
 0x119   :  { %v2547_v24 = vadd.f32 %v248_v23, %v110_v31  ;;  %v2550_v60 = vadd.f32 %v361_v21, %v2503_v35 }
 0x11a   :  { %v250_v15 = vpop.f32.mrf.mxu0  ;;  %v363_v33 = vpop.f32.mrf.mxu1 }
 0x11b   :  { %3293 = vst [vmem:[#allocation52_spill] sm:$0xff] %v2547_v24  ;;  %3294 = vst [vmem:[#allocation53_spill] sm:$0xff] %v2550_v60  ;;  %v2552_v51 = vadd.f32 %v250_v15, %v114_v29  ;;  %v2555_v0 = vadd.f32 %v363_v33, %v2505_v28 }
 0x11d   :  { %3295 = vst [vmem:[#allocation54_spill] sm:$0xff] %v2552_v51  ;;  %3296 = vst [vmem:[#allocation55_spill] sm:$0xff] %v2555_v0 }
 0x11e   :  { %v254_v34 = vpop.f32.mrf.mxu0  ;;  %v367_v30 = vpop.f32.mrf.mxu1 }
 0x11f   :  { %v2557_v22 = vadd.f32 %v254_v34, %v110_v31  ;;  %v2560_v26 = vadd.f32 %v367_v30, %v2503_v35 }
 0x120   :  { %v256_v25 = vpop.f32.mrf.mxu0  ;;  %v369_v23 = vpop.f32.mrf.mxu1 }
 0x121   :  { %3297 = vst [vmem:[#allocation56_spill] sm:$0xff] %v2557_v22  ;;  %3298 = vst [vmem:[#allocation57_spill] sm:$0xff] %v2560_v26  ;;  %v2562_v24 = vadd.f32 %v256_v25, %v114_v29  ;;  %v2565_v21 = vadd.f32 %v369_v23, %v2505_v28  ;;  %v219_v25 = vadd.f32 %v2492_v42, %v110_v31 }
 0x122   :  { %v221_v23 = vadd.f32 %v2499_v20, %v114_v29 }
 0x123   :  { %3299 = vst [vmem:[#allocation58_spill] sm:$0xff] %v2562_v24  ;;  %3300 = vst [vmem:[#allocation59_spill] sm:$0xff] %v2565_v21 }
 0x124   :  { %v260_v60 = vpop.f32.mrf.mxu0  ;;  %v373_v15 = vpop.f32.mrf.mxu1 }
 0x125   :  { %v2567_v51 = vadd.f32 %v260_v60, %v110_v31  ;;  %v2570_v33 = vadd.f32 %v373_v15, %v2503_v35 }
 0x126   :  { %v262_v0 = vpop.f32.mrf.mxu0  ;;  %v375_v34 = vpop.f32.mrf.mxu1 }
 0x127   :  { %3301 = vst [vmem:[#allocation60_spill] sm:$0xff] %v2567_v51  ;;  %3302 = vst [vmem:[#allocation61_spill] sm:$0xff] %v2570_v33  ;;  %v2572_v22 = vadd.f32 %v262_v0, %v114_v29  ;;  %v2575_v30 = vadd.f32 %v375_v34, %v2505_v28  ;;  %v334_v0 = vadd.f32 %v2501_v32, %v2505_v28 }
 0x128   :  { %v332_v34 = vadd.f32 %v2494_v6, %v2503_v35 }
 0x129   :  { %3303 = vst [vmem:[#allocation62_spill] sm:$0xff] %v2572_v22  ;;  %3304 = vst [vmem:[#allocation63_spill] sm:$0xff] %v2575_v30 }
 0x12a   :  { %v510_v26 = vpop.f32.mrf.mxu0  ;;  %v581_v51 = vpop.f32.mrf.mxu1 }
 0x12b   :  { %v586_v21 = vadd.f32 %v510_v26, %v219_v25  ;;  %v588_v30 = vadd.f32 %v581_v51, %v332_v34  ;;  %v3305_v51 = vld [vmem:[#allocation16_spill] sm:$0xff]  ;;  %v3310_v34 = vld [vmem:[#allocation21_spill] sm:$0xff] }
 0x12c   :  { %v512_v24 = vpop.f32.mrf.mxu0  ;;  %v583_v33 = vpop.f32.mrf.mxu1 }
 0x12d   :  { %v1842_v27 = vmul.f32 -1.442695, %v586_v21  ;;  %v587_v60 = vadd.f32 %v512_v24, %v221_v23  ;;  %v589_v22 = vadd.f32 %v583_v33, %v334_v0  ;;  %v3309_v0 = vld [vmem:[#allocation20_spill] sm:$0xff] }
 0x12f   :  { %1875 = vpow2.f32 %v1842_v27  ;;  %v1843_v15 = vmul.f32 -1.442695, %v587_v60  ;;  %v1844_v31 = vmul.f32 -1.442695, %v589_v22  ;;  %v3307_v60 = vld [vmem:[#allocation18_spill] sm:$0xff] }
 0x131   :  { %1877 = vpow2.f32 %v1843_v15  ;;  %v3308_v15 = vld [vmem:[#allocation19_spill] sm:$0xff] }
 0x132   :  { %1879 = vpow2.f32 %v1844_v31  ;;  %v3311_v31 = vld [vmem:[#allocation22_spill] sm:$0xff] }
 0x13c   :  { %v1876_v42 = vpop.eup %1875 }
 0x13d   :  { %v593_v20 = vadd.f32 1.0, %v1876_v42  ;;  %v3312_v42 = vld [vmem:[#allocation23_spill] sm:$0xff] }
 0x13e   :  { %v1878_v29 = vpop.eup %1877 }
 0x13f   :  { %1881 = vrcp.f32 %v593_v20  ;;  %v599_v24 = vadd.f32 1.0, %v1878_v29  ;;  %v1880_v27 = vpop.eup %1879  ;;  %v3313_v20 = vld [vmem:[#allocation24_spill] sm:$0xff]  ;;  %v3314_v29 = vld [vmem:[#allocation25_spill] sm:$0xff] }
 0x140   :  { %1883 = vtanh.f32 %v588_v30  ;;  %v606_v23 = vadd.f32 1.0, %v1880_v27  ;;  %v3306_v30 = vld [vmem:[#allocation17_spill] sm:$0xff]  ;;  %v3316_v27 = vld [vmem:[#allocation27_spill] sm:$0xff] }
 0x141   :  { %1885 = vrcp.f32 %v599_v24  ;;  %v3315_v24 = vld [vmem:[#allocation26_spill] sm:$0xff] }
 0x142   :  { %1887 = vrcp.f32 %v606_v23  ;;  %v3320_v23 = vld [vmem:[#allocation31_spill] sm:$0xff] }
 0x14c   :  { %v1882_v26 = vpop.eup %1881 }
 0x14d   :  { %v1884_v21 = vpop.eup %1883 }
 0x14e   :  { %v1886_v25 = vpop.eup %1885  ;;  %v610_v32 = vmul.f32 %v1884_v21, %v1882_v26  ;;  %v3317_v26 = vld [vmem:[#allocation28_spill] sm:$0xff]  ;;  %v3318_v21 = vld [vmem:[#allocation29_spill] sm:$0xff] }
 0x14f   :  { %v609_v28 = vmul.f32 0.0, %v1886_v25  ;;  %v1888_v35 = vpop.eup %1887  ;;  %v3319_v25 = vld [vmem:[#allocation30_spill] sm:$0xff] }
 0x151   :  { %v2583_v33 = vadd.f32 %v610_v32, %v609_v28  ;;  %v3321_v28 = vld [vmem:[#allocation32_spill] sm:$0xff]  ;;  %v3322_v32 = vld [vmem:[#allocation33_spill] sm:$0xff] }
 0x153   :  { %1889 = vtanh.f32 %v2583_v33 }
 0x160   :  { %v1890_v22 = vpop.eup %1889 }
 0x161   :  { %v613_v6 = vmul.f32 %v1890_v22, %v1888_v35  ;;  %v3323_v35 = vld [vmem:[#allocation34_spill] sm:$0xff]  ;;  %v3324_v22 = vmov 0.0  }
 0x163   :  { %679 = vmatmul.mubr.f32.vlgmr.msra.gmra.mxu0 %v613_v6  ;;  %750 = vmatmul.mubr.f32.vlgmr.msra.gmra.mxu1 %v613_v6  ;;  %v3325_v6 = vld [vmem:[#allocation35_spill] sm:$0xff] }
 0x164   :  { %785 = vmatpush1.msra.mxu0 %v2202_v36  ;;  %856 = vmatpush1.msra.mxu1 %v2204_v37 }
 0x165   :  { %786 = vmatprep.subr.mxu0 %v2208_v38  ;;  %857 = vmatprep.subr.mxu1 %v2210_v39 }
 0x166   :  { %787 = vmatpush1.msra.mxu0 %v2216_v40  ;;  %858 = vmatpush1.msra.mxu1 %v2218_v41 }
 0x167   :  { %788 = vmatprep.subr.mxu0 %v2224_v43  ;;  %859 = vmatprep.subr.mxu1 %v2226_v44 }
 0x168   :  { %789 = vmatpush1.msra.mxu0 %v2230_v45  ;;  %860 = vmatpush1.msra.mxu1 %v2232_v46 }
 0x169   :  { %790 = vmatprep.subr.mxu0 %v2236_v47  ;;  %861 = vmatprep.subr.mxu1 %v2238_v48 }
 0x16a   :  { %791 = vmatpush1.msra.mxu0 %v2244_v49  ;;  %862 = vmatpush1.msra.mxu1 %v2246_v50 }
 0x16b   :  { %792 = vmatprep.subr.mxu0 %v2252_v52  ;;  %863 = vmatprep.subr.mxu1 %v2254_v53 }
 0x16c   :  { %793 = vmatpush1.msra.mxu0 %v2258_v54  ;;  %864 = vmatpush1.msra.mxu1 %v2260_v55 }
 0x16d   :  { %794 = vmatprep.subr.mxu0 %v2264_v56  ;;  %865 = vmatprep.subr.mxu1 %v2266_v57 }
 0x16e   :  { %795 = vmatpush1.msra.mxu0 %v2272_v58  ;;  %866 = vmatpush1.msra.mxu1 %v2274_v59 }
 0x16f   :  { %796 = vmatprep.subr.mxu0 %v2280_v61  ;;  %867 = vmatprep.subr.mxu1 %v2282_v62 }
 0x170   :  { %797 = vmatpush1.msra.mxu0 %v2286_v63  ;;  %868 = vmatpush1.msra.mxu1 %v2288_v1 }
 0x171   :  { %798 = vmatprep.subr.mxu0 %v2292_v2  ;;  %869 = vmatprep.subr.mxu1 %v2294_v3 }
 0x172   :  { %799 = vmatpush1.msra.mxu0 %v2300_v4  ;;  %870 = vmatpush1.msra.mxu1 %v2302_v5 }
 0x173   :  { %800 = vmatprep.subr.mxu0 %v2308_v7  ;;  %871 = vmatprep.subr.mxu1 %v2310_v8 }
 0x174   :  { %801 = vmatpush1.msra.mxu0 %v2314_v9  ;;  %872 = vmatpush1.msra.mxu1 %v2316_v10 }
 0x175   :  { %802 = vmatprep.subr.mxu0 %v2320_v11  ;;  %873 = vmatprep.subr.mxu1 %v2322_v12 }
 0x176   :  { %803 = vmatpush1.msra.mxu0 %v2328_v13  ;;  %874 = vmatpush1.msra.mxu1 %v2330_v14 }
 0x177   :  { %804 = vmatprep.subr.mxu0 %v2336_v16  ;;  %875 = vmatprep.subr.mxu1 %v2338_v17 }
 0x178   :  { %805 = vmatpush1.msra.mxu0 %v2342_v18  ;;  %876 = vmatpush1.msra.mxu1 %v2344_v19 }
 0x179   :  { %806 = vmatprep.subr.mxu0 %v3305_v51  ;;  %877 = vmatprep.subr.mxu1 %v3306_v30 }
 0x17a   :  { %807 = vmatpush1.msra.mxu0 %v3307_v60  ;;  %878 = vmatpush1.msra.mxu1 %v3308_v15 }
 0x17b   :  { %808 = vmatprep.subr.mxu0 %v3309_v0  ;;  %879 = vmatprep.subr.mxu1 %v3310_v34  ;;  %v3331_v34 = vld [vmem:[#allocation37_spill] sm:$0xff] }
 0x17c   :  { %809 = vmatpush1.msra.mxu0 %v3311_v31  ;;  %880 = vmatpush1.msra.mxu1 %v3312_v42  ;;  %v3330_v31 = vld [vmem:[#allocation39_spill] sm:$0xff] }
 0x17d   :  { %810 = vmatprep.subr.mxu0 %v3313_v20  ;;  %881 = vmatprep.subr.mxu1 %v3314_v29 }
 0x17e   :  { %811 = vmatpush1.msra.mxu0 %v3315_v24  ;;  %882 = vmatpush1.msra.mxu1 %v3316_v27  ;;  %v3326_v27 = vld [vmem:[#allocation14_spill] sm:$0xff] }
 0x17f   :  { %812 = vmatprep.subr.mxu0 %v3317_v26  ;;  %883 = vmatprep.subr.mxu1 %v3318_v21  ;;  %v3327_v26 = vld [vmem:[#allocation15_spill] sm:$0xff] }
 0x180   :  { %813 = vmatpush1.msra.mxu0 %v3319_v25  ;;  %884 = vmatpush1.msra.mxu1 %v3320_v23  ;;  %v3328_v25 = vld [vmem:[#allocation36_spill] sm:$0xff] }
 0x181   :  { %814 = vmatprep.subr.mxu0 %v3321_v28  ;;  %885 = vmatprep.subr.mxu1 %v3322_v32  ;;  %v3329_v28 = vld [vmem:[#allocation38_spill] sm:$0xff] }
 0x182   :  { %815 = vmatpush1.msra.mxu0 %v3323_v35  ;;  %848 = vmatprep.mubr.f32.mxu0 %v3324_v22 }
 0x183   :  { %886 = vmatpush1.msra.mxu1 %v3325_v6  ;;  %919 = vmatprep.mubr.f32.mxu1 %v3324_v22 }
 0x184   :  { %954 = vmatprep.subr.mxu0 %v3326_v27  ;;  %1025 = vmatprep.subr.mxu1 %v3327_v26 }
 0x223   :  { %v680_v21 = vpop.f32.mrf.mxu0  ;;  %v751_v32 = vpop.f32.mrf.mxu1 }
 0x224   :  { %v756_v24 = vadd.f32 %v680_v21, %v3328_v25  ;;  %v758_v22 = vadd.f32 %v751_v32, %v3331_v34 }
 0x225   :  { %v682_v23 = vpop.f32.mrf.mxu0  ;;  %v753_v42 = vpop.f32.mrf.mxu1 }
 0x226   :  { %v1845_v29 = vmul.f32 -1.442695, %v756_v24  ;;  %v757_v20 = vadd.f32 %v682_v23, %v3329_v28  ;;  %v759_v6 = vadd.f32 %v753_v42, %v3330_v31 }
 0x228   :  { %1891 = vpow2.f32 %v1845_v29  ;;  %v1846_v35 = vmul.f32 -1.442695, %v757_v20  ;;  %v1847_v0 = vmul.f32 -1.442695, %v759_v6 }
 0x22a   :  { %1893 = vpow2.f32 %v1846_v35 }
 0x22b   :  { %1895 = vtanh.f32 %v758_v22 }
 0x22c   :  { %1897 = vpow2.f32 %v1847_v0 }
 0x235   :  { %v1892_v27 = vpop.eup %1891 }
 0x236   :  { %v763_v15 = vadd.f32 1.0, %v1892_v27 }
 0x237   :  { %v1894_v26 = vpop.eup %1893 }
 0x238   :  { %1899 = vrcp.f32 %v763_v15  ;;  %v769_v21 = vadd.f32 1.0, %v1894_v26  ;;  %v1896_v24 = vpop.eup %1895  ;;  %v3353_v15 = vld [vmem:[#allocation42_spill] sm:$0xff]  ;;  %v3354_v26 = vld [vmem:[#allocation43_spill] sm:$0xff] }
 0x239   :  { %v1898_v25 = vpop.eup %1897 }
 0x23a   :  { %1901 = vrcp.f32 %v769_v21  ;;  %v776_v28 = vadd.f32 1.0, %v1898_v25 }
 0x23c   :  { %1903 = vrcp.f32 %v776_v28 }
 0x245   :  { %v1900_v29 = vpop.eup %1899 }
 0x246   :  { %v780_v23 = vmul.f32 %v1900_v29, %v1896_v24  ;;  %v3355_v24 = vld [vmem:[#allocation41_spill] sm:$0xff] }
 0x247   :  { %v1902_v20 = vpop.eup %1901 }
 0x248   :  { %v779_v35 = vmul.f32 %v1902_v20, %v2583_v33 }
 0x249   :  { %v1904_v34 = vpop.eup %1903 }
 0x24a   :  { %v2657_v31 = vadd.f32 %v780_v23, %v779_v35 }
 0x24c   :  { %1905 = vtanh.f32 %v2657_v31 }
 0x259   :  { %v1906_v42 = vpop.eup %1905 }
 0x25a   :  { %v783_v32 = vmul.f32 %v1906_v42, %v1904_v34 }
 0x25c   :  { %849 = vmatmul.mubr.f32.vlgmr.msra.gmra.mxu0 %v783_v32  ;;  %920 = vmatmul.mubr.f32.vlgmr.msra.gmra.mxu1 %v783_v32 }
 0x25d   :  { %955 = vmatpush1.msra.mxu0 %v2202_v36  ;;  %1026 = vmatpush1.msra.mxu1 %v2204_v37  ;;  %v3332_v36 = vld [vmem:[#allocation19_spill] sm:$0xff]  ;;  %v3333_v37 = vld [vmem:[#allocation20_spill] sm:$0xff] }
 0x25e   :  { %956 = vmatprep.subr.mxu0 %v2208_v38  ;;  %1027 = vmatprep.subr.mxu1 %v2210_v39  ;;  %v3334_v38 = vld [vmem:[#allocation21_spill] sm:$0xff]  ;;  %v3335_v39 = vld [vmem:[#allocation22_spill] sm:$0xff] }
 0x25f   :  { %957 = vmatpush1.msra.mxu0 %v2216_v40  ;;  %1028 = vmatpush1.msra.mxu1 %v2218_v41  ;;  %v3336_v40 = vld [vmem:[#allocation23_spill] sm:$0xff]  ;;  %v3337_v41 = vld [vmem:[#allocation24_spill] sm:$0xff] }
 0x260   :  { %958 = vmatprep.subr.mxu0 %v2224_v43  ;;  %1029 = vmatprep.subr.mxu1 %v2226_v44  ;;  %v3338_v43 = vld [vmem:[#allocation25_spill] sm:$0xff]  ;;  %v3339_v44 = vld [vmem:[#allocation26_spill] sm:$0xff] }
 0x261   :  { %959 = vmatpush1.msra.mxu0 %v2230_v45  ;;  %1030 = vmatpush1.msra.mxu1 %v2232_v46  ;;  %v3340_v45 = vld [vmem:[#allocation27_spill] sm:$0xff]  ;;  %v3341_v46 = vld [vmem:[#allocation28_spill] sm:$0xff] }
 0x262   :  { %960 = vmatprep.subr.mxu0 %v2236_v47  ;;  %1031 = vmatprep.subr.mxu1 %v2238_v48  ;;  %v3342_v47 = vld [vmem:[#allocation29_spill] sm:$0xff]  ;;  %v3343_v48 = vld [vmem:[#allocation30_spill] sm:$0xff] }
 0x263   :  { %961 = vmatpush1.msra.mxu0 %v2244_v49  ;;  %1032 = vmatpush1.msra.mxu1 %v2246_v50  ;;  %v3344_v49 = vld [vmem:[#allocation31_spill] sm:$0xff]  ;;  %v3345_v50 = vld [vmem:[#allocation32_spill] sm:$0xff] }
 0x264   :  { %962 = vmatprep.subr.mxu0 %v2252_v52  ;;  %1033 = vmatprep.subr.mxu1 %v2254_v53  ;;  %v3346_v52 = vld [vmem:[#allocation33_spill] sm:$0xff]  ;;  %v3347_v53 = vld [vmem:[#allocation34_spill] sm:$0xff] }
 0x265   :  { %963 = vmatpush1.msra.mxu0 %v2258_v54  ;;  %1034 = vmatpush1.msra.mxu1 %v2260_v55  ;;  %v3348_v54 = vmov 0.0   ;;  %v3349_v55 = vld [vmem:[#allocation35_spill] sm:$0xff] }
 0x266   :  { %964 = vmatprep.subr.mxu0 %v2264_v56  ;;  %1035 = vmatprep.subr.mxu1 %v2266_v57  ;;  %v2724_v56 = vld [vmem:[#allocation9 + $0x1e8] sm:$0xff]  ;;  %v2727_v57 = vld [vmem:[#allocation9 + $0x1f8] sm:$0xff] }
 0x267   :  { %965 = vmatpush1.msra.mxu0 %v2272_v58  ;;  %1036 = vmatpush1.msra.mxu1 %v2274_v59  ;;  %3350 = vst [vmem:[#allocation16_spill] sm:$0xff] %v2724_v56  ;;  %3351 = vst [vmem:[#allocation17_spill] sm:$0xff] %v2727_v57  ;;  %v3352_v59 = vld [vmem:[#allocation40_spill] sm:$0xff] }
 0x268   :  { %966 = vmatprep.subr.mxu0 %v2280_v61  ;;  %1037 = vmatprep.subr.mxu1 %v2282_v62 }
 0x269   :  { %967 = vmatpush1.msra.mxu0 %v2286_v63  ;;  %1038 = vmatpush1.msra.mxu1 %v2288_v1 }
 0x26a   :  { %968 = vmatprep.subr.mxu0 %v2292_v2  ;;  %1039 = vmatprep.subr.mxu1 %v2294_v3 }
 0x26b   :  { %969 = vmatpush1.msra.mxu0 %v2300_v4  ;;  %1040 = vmatpush1.msra.mxu1 %v2302_v5 }
 0x26c   :  { %970 = vmatprep.subr.mxu0 %v2308_v7  ;;  %1041 = vmatprep.subr.mxu1 %v2310_v8 }
 0x26d   :  { %971 = vmatpush1.msra.mxu0 %v2314_v9  ;;  %1042 = vmatpush1.msra.mxu1 %v2316_v10 }
 0x26e   :  { %972 = vmatprep.subr.mxu0 %v2320_v11  ;;  %1043 = vmatprep.subr.mxu1 %v2322_v12 }
 0x26f   :  { %973 = vmatpush1.msra.mxu0 %v2328_v13  ;;  %1044 = vmatpush1.msra.mxu1 %v2330_v14 }
 0x270   :  { %974 = vmatprep.subr.mxu0 %v2336_v16  ;;  %1045 = vmatprep.subr.mxu1 %v2338_v17 }
 0x271   :  { %975 = vmatpush1.msra.mxu0 %v2342_v18  ;;  %1046 = vmatpush1.msra.mxu1 %v2344_v19 }
 0x272   :  { %976 = vmatprep.subr.mxu0 %v3305_v51  ;;  %1047 = vmatprep.subr.mxu1 %v3306_v30 }
 0x273   :  { %977 = vmatpush1.msra.mxu0 %v3307_v60  ;;  %1048 = vmatpush1.msra.mxu1 %v3332_v36 }
 0x274   :  { %978 = vmatprep.subr.mxu0 %v3333_v37  ;;  %1049 = vmatprep.subr.mxu1 %v3334_v38 }
 0x275   :  { %979 = vmatpush1.msra.mxu0 %v3335_v39  ;;  %1050 = vmatpush1.msra.mxu1 %v3336_v40 }
 0x276   :  { %980 = vmatprep.subr.mxu0 %v3337_v41  ;;  %1051 = vmatprep.subr.mxu1 %v3338_v43 }
 0x277   :  { %981 = vmatpush1.msra.mxu0 %v3339_v44  ;;  %1052 = vmatpush1.msra.mxu1 %v3340_v45 }
 0x278   :  { %982 = vmatprep.subr.mxu0 %v3341_v46  ;;  %1053 = vmatprep.subr.mxu1 %v3342_v47 }
 0x279   :  { %983 = vmatpush1.msra.mxu0 %v3343_v48  ;;  %1054 = vmatpush1.msra.mxu1 %v3344_v49 }
 0x27a   :  { %984 = vmatprep.subr.mxu0 %v3345_v50  ;;  %1055 = vmatprep.subr.mxu1 %v3346_v52 }
 0x27b   :  { %985 = vmatpush1.msra.mxu0 %v3347_v53  ;;  %1018 = vmatprep.mubr.f32.mxu0 %v3348_v54 }
 0x27c   :  { %1056 = vmatpush1.msra.mxu1 %v3349_v55  ;;  %1089 = vmatprep.mubr.f32.mxu1 %v3348_v54 }
 0x27d   :  { %1124 = vmatprep.subr.mxu0 %v2724_v56  ;;  %1195 = vmatprep.subr.mxu1 %v2727_v57 }
 0x31c   :  { %v850_v58 = vpop.f32.mrf.mxu0  ;;  %v921_v22 = vpop.f32.mrf.mxu1 }
 0x31d   :  { %v926_v61 = vadd.f32 %v850_v58, %v3352_v59  ;;  %v928_v25 = vadd.f32 %v921_v22, %v3355_v24  ;;  %v2753_v24 = vld [vmem:[#allocation9 + $0x1d0] sm:$0xff] }
 0x31e   :  { %v852_v62 = vpop.f32.mrf.mxu0  ;;  %v923_v27 = vpop.f32.mrf.mxu1 }
 0x31f   :  { %v1848_v33 = vmul.f32 -1.442695, %v926_v61  ;;  %v927_v0 = vadd.f32 %v852_v62, %v3353_v15  ;;  %v929_v21 = vadd.f32 %v923_v27, %v3354_v26  ;;  %v2741_v27 = vld [vmem:[#allocation9 + $0x1f0] sm:$0xff]  ;;  %v2744_v26 = vld [vmem:[#allocation9 + $0x1c8] sm:$0xff] }
 0x321   :  { %1907 = vpow2.f32 %v1848_v33  ;;  %v1849_v6 = vmul.f32 -1.442695, %v927_v0  ;;  %v1850_v29 = vmul.f32 -1.442695, %v929_v21  ;;  %v2750_v21 = vld [vmem:[#allocation9 + $0x1c0] sm:$0xff] }
 0x323   :  { %1909 = vpow2.f32 %v1849_v6  ;;  %v2738_v6 = vld [vmem:[#allocation9 + $0x1e0] sm:$0xff] }
 0x324   :  { %1911 = vtanh.f32 %v928_v25  ;;  %v2756_v25 = vld [vmem:[#allocation9 + $0x1a8] sm:$0xff] }
 0x325   :  { %1913 = vpow2.f32 %v1850_v29  ;;  %v2759_v29 = vld [vmem:[#allocation9 + $0x1b8] sm:$0xff] }
 0x32e   :  { %v1908_v23 = vpop.eup %1907 }
 0x32f   :  { %v933_v20 = vadd.f32 1.0, %v1908_v23  ;;  %v2762_v23 = vld [vmem:[#allocation9 + $0x1a0] sm:$0xff] }
 0x330   :  { %v1910_v28 = vpop.eup %1909 }
 0x331   :  { %1915 = vrcp.f32 %v933_v20  ;;  %v939_v35 = vadd.f32 1.0, %v1910_v28  ;;  %v1912_v34 = vpop.eup %1911  ;;  %v2765_v20 = vld [vmem:[#allocation9 + $0x1b0] sm:$0xff]  ;;  %v2768_v28 = vld [vmem:[#allocation9 + $0x188] sm:$0xff] }
 0x332   :  { %v1914_v42 = vpop.eup %1913 }
 0x333   :  { %1917 = vrcp.f32 %v939_v35  ;;  %v946_v61 = vadd.f32 1.0, %v1914_v42  ;;  %v2771_v35 = vld [vmem:[#allocation9 + $0x198] sm:$0xff]  ;;  %v2777_v42 = vld [vmem:[#allocation9 + $0x190] sm:$0xff] }
 0x335   :  { %1919 = vrcp.f32 %v946_v61  ;;  %v2789_v61 = vld [vmem:[#allocation9 + $0x170] sm:$0xff] }
 0x336   :  { %3357 = vst [vmem:[#allocation14_spill] sm:$0xff] %v2789_v61 }
 0x33e   :  { %v1916_v32 = vpop.eup %1915 }
 0x33f   :  { %v950_v58 = vmul.f32 %v1916_v32, %v1912_v34  ;;  %v2774_v34 = vld [vmem:[#allocation9 + $0x180] sm:$0xff]  ;;  %v2780_v32 = vld [vmem:[#allocation9 + $0x168] sm:$0xff] }
 0x340   :  { %v1918_v59 = vpop.eup %1917 }
 0x341   :  { %v949_v62 = vmul.f32 %v1918_v59, %v2657_v31  ;;  %v2747_v31 = vld [vmem:[#allocation9 + $0x1d8] sm:$0xff]  ;;  %v2786_v59 = vld [vmem:[#allocation9 + $0x160] sm:$0xff] }
 0x342   :  { %v1920_v15 = vpop.eup %1919  ;;  %3356 = vst [vmem:[#allocation18_spill] sm:$0xff] %v2786_v59 }
 0x343   :  { %v2735_v33 = vadd.f32 %v950_v58, %v949_v62  ;;  %v2783_v58 = vld [vmem:[#allocation9 + $0x178] sm:$0xff]  ;;  %v2792_v62 = vld [vmem:[#allocation9 + $0x148] sm:$0xff] }
 0x345   :  { %1921 = vtanh.f32 %v2735_v33 }
 0x352   :  { %v1922_v0 = vpop.eup %1921 }
 0x353   :  { %v953_v22 = vmul.f32 %v1922_v0, %v1920_v15  ;;  %v2795_v15 = vld [vmem:[#allocation9 + $0x158] sm:$0xff]  ;;  %v2798_v0 = vld [vmem:[#allocation9 + $0x140] sm:$0xff] }
 0x355   :  { %1019 = vmatmul.mubr.f32.vlgmr.msra.gmra.mxu0 %v953_v22  ;;  %1090 = vmatmul.mubr.f32.vlgmr.msra.gmra.mxu1 %v953_v22  ;;  %v2801_v22 = vld [vmem:[#allocation9 + $0x150] sm:$0xff] }
 0x356   :  { %1125 = vmatpush1.msra.mxu0 %v2738_v6  ;;  %1196 = vmatpush1.msra.mxu1 %v2741_v27 }
 0x357   :  { %1126 = vmatprep.subr.mxu0 %v2744_v26  ;;  %1197 = vmatprep.subr.mxu1 %v2747_v31 }
 0x358   :  { %1127 = vmatpush1.msra.mxu0 %v2750_v21  ;;  %1198 = vmatpush1.msra.mxu1 %v2753_v24 }
 0x359   :  { %1128 = vmatprep.subr.mxu0 %v2756_v25  ;;  %1199 = vmatprep.subr.mxu1 %v2759_v29 }
 0x35a   :  { %1129 = vmatpush1.msra.mxu0 %v2762_v23  ;;  %1200 = vmatpush1.msra.mxu1 %v2765_v20 }
 0x35b   :  { %1130 = vmatprep.subr.mxu0 %v2768_v28  ;;  %1201 = vmatprep.subr.mxu1 %v2771_v35 }
 0x35c   :  { %1131 = vmatpush1.msra.mxu0 %v2774_v34  ;;  %1202 = vmatpush1.msra.mxu1 %v2777_v42 }
 0x35d   :  { %1132 = vmatprep.subr.mxu0 %v2780_v32  ;;  %1203 = vmatprep.subr.mxu1 %v2783_v58 }
 0x35e   :  { %1133 = vmatpush1.msra.mxu0 %v2786_v59  ;;  %1204 = vmatpush1.msra.mxu1 %v2789_v61  ;;  %v2804_v59 = vld [vmem:[#allocation9 + $0x128] sm:$0xff]  ;;  %v2807_v61 = vld [vmem:[#allocation9 + $0x138] sm:$0xff] }
 0x35f   :  { %1134 = vmatprep.subr.mxu0 %v2792_v62  ;;  %1205 = vmatprep.subr.mxu1 %v2795_v15 }
 0x360   :  { %1135 = vmatpush1.msra.mxu0 %v2798_v0  ;;  %1206 = vmatpush1.msra.mxu1 %v2801_v22 }
 0x361   :  { %1136 = vmatprep.subr.mxu0 %v2804_v59  ;;  %1207 = vmatprep.subr.mxu1 %v2807_v61 }
 0x362   :  { %1137 = vmatpush1.msra.mxu0 %v2286_v63  ;;  %1208 = vmatpush1.msra.mxu1 %v2288_v1  ;;  %v3358_v1 = vld [vmem:[#allocation44_spill] sm:$0xff] }
 0x363   :  { %1138 = vmatprep.subr.mxu0 %v2292_v2  ;;  %1209 = vmatprep.subr.mxu1 %v2294_v3 }
 0x364   :  { %1139 = vmatpush1.msra.mxu0 %v2300_v4  ;;  %1210 = vmatpush1.msra.mxu1 %v2302_v5  ;;  %v3359_v5 = vld [vmem:[#allocation46_spill] sm:$0xff] }
 0x365   :  { %1140 = vmatprep.subr.mxu0 %v2308_v7  ;;  %1211 = vmatprep.subr.mxu1 %v2310_v8 }
 0x366   :  { %1141 = vmatpush1.msra.mxu0 %v2314_v9  ;;  %1212 = vmatpush1.msra.mxu1 %v2316_v10 }
 0x367   :  { %1142 = vmatprep.subr.mxu0 %v2320_v11  ;;  %1213 = vmatprep.subr.mxu1 %v2322_v12  ;;  %v3360_v11 = vld [vmem:[#allocation47_spill] sm:$0xff] }
 0x368   :  { %1143 = vmatpush1.msra.mxu0 %v2328_v13  ;;  %1214 = vmatpush1.msra.mxu1 %v2330_v14  ;;  %v3361_v13 = vld [vmem:[#allocation45_spill] sm:$0xff] }
 0x369   :  { %1144 = vmatprep.subr.mxu0 %v2336_v16  ;;  %1215 = vmatprep.subr.mxu1 %v2338_v17 }
 0x36a   :  { %1145 = vmatpush1.msra.mxu0 %v2342_v18  ;;  %1216 = vmatpush1.msra.mxu1 %v2344_v19 }
 0x36b   :  { %1146 = vmatprep.subr.mxu0 %v3305_v51  ;;  %1217 = vmatprep.subr.mxu1 %v3306_v30 }
 0x36c   :  { %1147 = vmatpush1.msra.mxu0 %v3307_v60  ;;  %1218 = vmatpush1.msra.mxu1 %v3332_v36 }
 0x36d   :  { %1148 = vmatprep.subr.mxu0 %v3333_v37  ;;  %1219 = vmatprep.subr.mxu1 %v3334_v38 }
 0x36e   :  { %1149 = vmatpush1.msra.mxu0 %v3335_v39  ;;  %1220 = vmatpush1.msra.mxu1 %v3336_v40 }
 0x36f   :  { %1150 = vmatprep.subr.mxu0 %v3337_v41  ;;  %1221 = vmatprep.subr.mxu1 %v3338_v43 }
 0x370   :  { %1151 = vmatpush1.msra.mxu0 %v3339_v44  ;;  %1222 = vmatpush1.msra.mxu1 %v3340_v45 }
 0x371   :  { %1152 = vmatprep.subr.mxu0 %v3341_v46  ;;  %1223 = vmatprep.subr.mxu1 %v3342_v47  ;;  %v3362_v46 = vld [vmem:[#allocation18_spill] sm:$0xff] }
 0x372   :  { %1153 = vmatpush1.msra.mxu0 %v3343_v48  ;;  %1224 = vmatpush1.msra.mxu1 %v3344_v49  ;;  %v3363_v47 = vld [vmem:[#allocation14_spill] sm:$0xff]  ;;  %v2884_v48 = vld [vmem:[#allocation9 + $0x120] sm:$0xff]  ;;  %v2887_v49 = vld [vmem:[#allocation9 + $0x130] sm:$0xff] }
 0x373   :  { %1154 = vmatprep.subr.mxu0 %v3345_v50  ;;  %1225 = vmatprep.subr.mxu1 %v3346_v52  ;;  %v2890_v50 = vld [vmem:[#allocation9 + $0x108] sm:$0xff]  ;;  %v2893_v52 = vld [vmem:[#allocation9 + $0x118] sm:$0xff] }
 0x374   :  { %1155 = vmatpush1.msra.mxu0 %v3347_v53  ;;  %1188 = vmatprep.mubr.f32.mxu0 %v3348_v54  ;;  %v2896_v53 = vld [vmem:[#allocation9 + $0x100] sm:$0xff] }
 0x375   :  { %1226 = vmatpush1.msra.mxu1 %v3349_v55  ;;  %1259 = vmatprep.mubr.f32.mxu1 %v3348_v54  ;;  %v2899_v55 = vld [vmem:[#allocation9 + $0x110] sm:$0xff] }
 0x376   :  { %1294 = vmatprep.subr.mxu0 %v2724_v56  ;;  %1365 = vmatprep.subr.mxu1 %v2727_v57 }
 0x415   :  { %v1020_v63 = vpop.f32.mrf.mxu0  ;;  %v1091_v8 = vpop.f32.mrf.mxu1 }
 0x416   :  { %v1096_v2 = vadd.f32 %v1020_v63, %v3358_v1  ;;  %v1098_v14 = vadd.f32 %v1091_v8, %v3361_v13  ;;  %v2905_v63 = vld [vmem:[#allocation9 + $0xf8] sm:$0xff]  ;;  %v2908_v1 = vld [vmem:[#allocation9 + $0xe0] sm:$0xff]  ;;  %v2926_v8 = vld [vmem:[#allocation9 + $0xa8] sm:$0xff] }
 0x417   :  { %v1022_v3 = vpop.f32.mrf.mxu0  ;;  %v1093_v10 = vpop.f32.mrf.mxu1  ;;  %v2941_v13 = vld [vmem:[#allocation9 + $0x98] sm:$0xff] }
 0x418   :  { %v1851_v4 = vmul.f32 -1.442695, %v1096_v2  ;;  %v1097_v7 = vadd.f32 %v1022_v3, %v3359_v5  ;;  %v1099_v12 = vadd.f32 %v1093_v10, %v3360_v11  ;;  %v2911_v2 = vld [vmem:[#allocation9 + $0xf0] sm:$0xff]  ;;  %v2914_v3 = vld [vmem:[#allocation9 + $0xc8] sm:$0xff]  ;;  %v2920_v5 = vld [vmem:[#allocation9 + $0xc0] sm:$0xff] }
 0x419   :  { %v2932_v10 = vld [vmem:[#allocation9 + $0xa0] sm:$0xff]  ;;  %v2935_v11 = vld [vmem:[#allocation9 + $0xb0] sm:$0xff] }
 0x41a   :  { %1923 = vpow2.f32 %v1851_v4  ;;  %v1852_v9 = vmul.f32 -1.442695, %v1097_v7  ;;  %v1853_v16 = vmul.f32 -1.442695, %v1099_v12  ;;  %v2917_v4 = vld [vmem:[#allocation9 + $0xd8] sm:$0xff]  ;;  %v2923_v7 = vld [vmem:[#allocation9 + $0xd0] sm:$0xff] }
 0x41b   :  { %v2938_v12 = vld [vmem:[#allocation9 + $0x88] sm:$0xff] }
 0x41c   :  { %1925 = vpow2.f32 %v1852_v9  ;;  %v2929_v9 = vld [vmem:[#allocation9 + $0xb8] sm:$0xff] }
 0x41d   :  { %1927 = vtanh.f32 %v1098_v14  ;;  %v2944_v14 = vld [vmem:[#allocation9 + $0x80] sm:$0xff] }
 0x41e   :  { %1929 = vpow2.f32 %v1853_v16  ;;  %v2947_v16 = vld [vmem:[#allocation9 + $0x90] sm:$0xff] }
 0x41f   :  { %3364 = vst [vmem:[#allocation15_spill] sm:$0xff] %v2947_v16 }
 0x427   :  { %v1924_v17 = vpop.eup %1923 }
 0x428   :  { %v1103_v18 = vadd.f32 1.0, %v1924_v17  ;;  %v2950_v17 = vld [vmem:[#allocation9 + $0x68] sm:$0xff] }
 0x429   :  { %v1926_v19 = vpop.eup %1925  ;;  %3365 = vst [vmem:[#allocation36_spill] sm:$0xff] %v2950_v17 }
 0x42a   :  { %1931 = vrcp.f32 %v1103_v18  ;;  %v1109_v51 = vadd.f32 1.0, %v1926_v19  ;;  %v1928_v30 = vpop.eup %1927  ;;  %v2953_v18 = vld [vmem:[#allocation9 + $0x78] sm:$0xff]  ;;  %v2956_v19 = vld [vmem:[#allocation9 + $0x60] sm:$0xff] }
 0x42b   :  { %v1930_v60 = vpop.eup %1929  ;;  %3366 = vst [vmem:[#allocation38_spill] sm:$0xff] %v2953_v18  ;;  %3367 = vst [vmem:[#allocation39_spill] sm:$0xff] %v2956_v19 }
 0x42c   :  { %1933 = vrcp.f32 %v1109_v51  ;;  %v1116_v39 = vadd.f32 1.0, %v1930_v60  ;;  %v2959_v51 = vld [vmem:[#allocation9 + $0x70] sm:$0xff]  ;;  %v2965_v60 = vld [vmem:[#allocation9 + $0x58] sm:$0xff] }
 0x42d   :  { %3368 = vst [vmem:[#allocation37_spill] sm:$0xff] %v2959_v51  ;;  %3370 = vst [vmem:[#allocation20_spill] sm:$0xff] %v2965_v60 }
 0x42e   :  { %1935 = vrcp.f32 %v1116_v39  ;;  %v2977_v39 = vld [vmem:[#allocation9 + $0x38] sm:$0xff] }
 0x42f   :  { %3374 = vst [vmem:[#allocation24_spill] sm:$0xff] %v2977_v39 }
 0x437   :  { %v1932_v36 = vpop.eup %1931 }
 0x438   :  { %v1120_v37 = vmul.f32 %v1932_v36, %v1928_v30  ;;  %v2962_v30 = vld [vmem:[#allocation9 + $0x48] sm:$0xff]  ;;  %v2968_v36 = vld [vmem:[#allocation9 + $0x40] sm:$0xff] }
 0x439   :  { %v1934_v38 = vpop.eup %1933  ;;  %3369 = vst [vmem:[#allocation19_spill] sm:$0xff] %v2962_v30  ;;  %3371 = vst [vmem:[#allocation21_spill] sm:$0xff] %v2968_v36 }
 0x43a   :  { %v1119_v40 = vmul.f32 %v1934_v38, %v2735_v33  ;;  %v2902_v33 = vld [vmem:[#allocation9 + $0xe8] sm:$0xff] }
 0x43b   :  { %v1936_v43 = vpop.eup %1935  ;;  %v2974_v38 = vld [vmem:[#allocation9 + $0x28] sm:$0xff] }
 0x43c   :  { %v2857_v41 = vadd.f32 %v1120_v37, %v1119_v40  ;;  %v2971_v37 = vld [vmem:[#allocation9 + $0x50] sm:$0xff]  ;;  %3373 = vst [vmem:[#allocation23_spill] sm:$0xff] %v2974_v38  ;;  %v2980_v40 = vld [vmem:[#allocation9 + $0x20] sm:$0xff] }
 0x43d   :  { %3372 = vst [vmem:[#allocation22_spill] sm:$0xff] %v2971_v37  ;;  %3375 = vst [vmem:[#allocation25_spill] sm:$0xff] %v2980_v40 }
 0x43e   :  { %1937 = vtanh.f32 %v2857_v41 }
 0x44b   :  { %v1938_v44 = vpop.eup %1937 }
 0x44c   :  { %v1123_v45 = vmul.f32 %v1938_v44, %v1936_v43  ;;  %v2983_v43 = vld [vmem:[#allocation9 + $0x30] sm:$0xff]  ;;  %v2986_v44 = vld [vmem:[#allocation9 + $0x8] sm:$0xff] }
 0x44d   :  { %3376 = vst [vmem:[#allocation26_spill] sm:$0xff] %v2983_v43  ;;  %3377 = vst [vmem:[#allocation27_spill] sm:$0xff] %v2986_v44 }
 0x44e   :  { %1189 = vmatmul.mubr.f32.vlgmr.msra.gmra.mxu0 %v1123_v45  ;;  %1260 = vmatmul.mubr.f32.vlgmr.msra.gmra.mxu1 %v1123_v45  ;;  %v2989_v45 = vld [vmem:[#allocation9 + $0x18] sm:$0xff] }
 0x44f   :  { %1295 = vmatpush1.msra.mxu0 %v2738_v6  ;;  %1366 = vmatpush1.msra.mxu1 %v2741_v27  ;;  %3378 = vst [vmem:[#allocation28_spill] sm:$0xff] %v2989_v45 }
 0x450   :  { %1296 = vmatprep.subr.mxu0 %v2744_v26  ;;  %1367 = vmatprep.subr.mxu1 %v2747_v31 }
 0x451   :  { %1297 = vmatpush1.msra.mxu0 %v2750_v21  ;;  %1368 = vmatpush1.msra.mxu1 %v2753_v24 }
 0x452   :  { %1298 = vmatprep.subr.mxu0 %v2756_v25  ;;  %1369 = vmatprep.subr.mxu1 %v2759_v29 }
 0x453   :  { %1299 = vmatpush1.msra.mxu0 %v2762_v23  ;;  %1370 = vmatpush1.msra.mxu1 %v2765_v20 }
 0x454   :  { %1300 = vmatprep.subr.mxu0 %v2768_v28  ;;  %1371 = vmatprep.subr.mxu1 %v2771_v35 }
 0x455   :  { %1301 = vmatpush1.msra.mxu0 %v2774_v34  ;;  %1372 = vmatpush1.msra.mxu1 %v2777_v42 }
 0x456   :  { %1302 = vmatprep.subr.mxu0 %v2780_v32  ;;  %1373 = vmatprep.subr.mxu1 %v2783_v58 }
 0x457   :  { %1303 = vmatpush1.msra.mxu0 %v3362_v46  ;;  %1374 = vmatpush1.msra.mxu1 %v3363_v47 }
 0x458   :  { %1304 = vmatprep.subr.mxu0 %v2792_v62  ;;  %1375 = vmatprep.subr.mxu1 %v2795_v15 }
 0x459   :  { %1305 = vmatpush1.msra.mxu0 %v2798_v0  ;;  %1376 = vmatpush1.msra.mxu1 %v2801_v22 }
 0x45a   :  { %1306 = vmatprep.subr.mxu0 %v2804_v59  ;;  %1377 = vmatprep.subr.mxu1 %v2807_v61 }
 0x45b   :  { %1307 = vmatpush1.msra.mxu0 %v2884_v48  ;;  %1378 = vmatpush1.msra.mxu1 %v2887_v49 }
 0x45c   :  { %1308 = vmatprep.subr.mxu0 %v2890_v50  ;;  %1379 = vmatprep.subr.mxu1 %v2893_v52 }
 0x45d   :  { %1309 = vmatpush1.msra.mxu0 %v2896_v53  ;;  %1380 = vmatpush1.msra.mxu1 %v2899_v55 }
 0x45e   :  { %1310 = vmatprep.subr.mxu0 %v2902_v33  ;;  %1381 = vmatprep.subr.mxu1 %v2905_v63 }
 0x45f   :  { %1311 = vmatpush1.msra.mxu0 %v2908_v1  ;;  %1382 = vmatpush1.msra.mxu1 %v2911_v2 }
 0x460   :  { %1312 = vmatprep.subr.mxu0 %v2914_v3  ;;  %1383 = vmatprep.subr.mxu1 %v2917_v4 }
 0x461   :  { %1313 = vmatpush1.msra.mxu0 %v2920_v5  ;;  %1384 = vmatpush1.msra.mxu1 %v2923_v7 }
 0x462   :  { %1314 = vmatprep.subr.mxu0 %v2926_v8  ;;  %1385 = vmatprep.subr.mxu1 %v2929_v9 }
 0x463   :  { %1315 = vmatpush1.msra.mxu0 %v2932_v10  ;;  %1386 = vmatpush1.msra.mxu1 %v2935_v11 }
 0x464   :  { %1316 = vmatprep.subr.mxu0 %v2938_v12  ;;  %1387 = vmatprep.subr.mxu1 %v2941_v13 }
 0x465   :  { %1317 = vmatpush1.msra.mxu0 %v2944_v14  ;;  %1388 = vmatpush1.msra.mxu1 %v2947_v16 }
 0x466   :  { %1318 = vmatprep.subr.mxu0 %v2950_v17  ;;  %1389 = vmatprep.subr.mxu1 %v2953_v18  ;;  %v3384_v18 = vld [vmem:[#allocation49_spill] sm:$0xff] }
 0x467   :  { %1319 = vmatpush1.msra.mxu0 %v2956_v19  ;;  %1390 = vmatpush1.msra.mxu1 %v2959_v51  ;;  %v3383_v19 = vld [vmem:[#allocation51_spill] sm:$0xff] }
 0x468   :  { %1320 = vmatprep.subr.mxu0 %v2962_v30  ;;  %1391 = vmatprep.subr.mxu1 %v2965_v60 }
 0x469   :  { %1321 = vmatpush1.msra.mxu0 %v2968_v36  ;;  %1392 = vmatpush1.msra.mxu1 %v2971_v37  ;;  %v3382_v36 = vld [vmem:[#allocation50_spill] sm:$0xff] }
 0x46a   :  { %1322 = vmatprep.subr.mxu0 %v2974_v38  ;;  %1393 = vmatprep.subr.mxu1 %v2977_v39  ;;  %v2992_v38 = vld [vmem:[#allocation9] sm:$0xff]  ;;  %v2996_v39 = vld [vmem:[#allocation9 + $0x10] sm:$0xff] }
 0x46b   :  { %1323 = vmatpush1.msra.mxu0 %v2980_v40  ;;  %1394 = vmatpush1.msra.mxu1 %v2983_v43  ;;  %3379 = vst [vmem:[#allocation29_spill] sm:$0xff] %v2992_v38  ;;  %3380 = vst [vmem:[#allocation30_spill] sm:$0xff] %v2996_v39  ;;  %v3381_v43 = vld [vmem:[#allocation48_spill] sm:$0xff] }
 0x46c   :  { %1324 = vmatprep.subr.mxu0 %v2986_v44  ;;  %1395 = vmatprep.subr.mxu1 %v2989_v45 }
 0x46d   :  { %1325 = vmatpush1.msra.mxu0 %v2992_v38  ;;  %1358 = vmatprep.mubr.f32.mxu0 %v3348_v54 }
 0x46e   :  { %1396 = vmatpush1.msra.mxu1 %v2996_v39  ;;  %1429 = vmatprep.mubr.f32.mxu1 %v3348_v54 }
 0x46f   :  { %1464 = vmatprep.subr.mxu0 %v2724_v56  ;;  %1535 = vmatprep.subr.mxu1 %v2727_v57 }
 0x50e   :  { %v1190_v44 = vpop.f32.mrf.mxu0  ;;  %v1261_v38 = vpop.f32.mrf.mxu1 }
 0x50f   :  { %v1266_v40 = vadd.f32 %v1190_v44, %v3381_v43  ;;  %v1268_v54 = vadd.f32 %v1261_v38, %v3384_v18  ;;  %v3390_v38 = vld [vmem:[#allocation19_spill] sm:$0xff] }
 0x510   :  { %v1192_v45 = vpop.f32.mrf.mxu0  ;;  %v1263_v51 = vpop.f32.mrf.mxu1 }
 0x511   :  { %v1854_v37 = vmul.f32 -1.442695, %v1266_v40  ;;  %v1267_v60 = vadd.f32 %v1192_v45, %v3382_v36  ;;  %v1269_v39 = vadd.f32 %v1263_v51, %v3383_v19  ;;  %v3389_v51 = vld [vmem:[#allocation37_spill] sm:$0xff] }
 0x513   :  { %1939 = vpow2.f32 %v1854_v37  ;;  %v1855_v30 = vmul.f32 -1.442695, %v1267_v60  ;;  %v1856_v17 = vmul.f32 -1.442695, %v1269_v39  ;;  %v3391_v39 = vld [vmem:[#allocation20_spill] sm:$0xff] }
 0x515   :  { %1941 = vpow2.f32 %v1855_v30 }
 0x516   :  { %1943 = vtanh.f32 %v1268_v54 }
 0x517   :  { %1945 = vpow2.f32 %v1856_v17  ;;  %v3388_v17 = vld [vmem:[#allocation39_spill] sm:$0xff] }
 0x520   :  { %v1940_v56 = vpop.eup %1939 }
 0x521   :  { %v1273_v16 = vadd.f32 1.0, %v1940_v56 }
 0x522   :  { %v1942_v57 = vpop.eup %1941 }
 0x523   :  { %1947 = vrcp.f32 %v1273_v16  ;;  %v1279_v43 = vadd.f32 1.0, %v1942_v57  ;;  %v1944_v40 = vpop.eup %1943  ;;  %v3385_v57 = vld [vmem:[#allocation15_spill] sm:$0xff]  ;;  %v3387_v16 = vld [vmem:[#allocation38_spill] sm:$0xff] }
 0x524   :  { %v1946_v36 = vpop.eup %1945 }
 0x525   :  { %1949 = vrcp.f32 %v1279_v43  ;;  %v1286_v30 = vadd.f32 1.0, %v1946_v36  ;;  %v3392_v43 = vld [vmem:[#allocation21_spill] sm:$0xff]  ;;  %v3394_v36 = vld [vmem:[#allocation23_spill] sm:$0xff] }
 0x527   :  { %1951 = vrcp.f32 %v1286_v30  ;;  %v3398_v30 = vld [vmem:[#allocation27_spill] sm:$0xff] }
 0x530   :  { %v1948_v37 = vpop.eup %1947 }
 0x531   :  { %v1290_v44 = vmul.f32 %v1948_v37, %v1944_v40  ;;  %v3393_v40 = vld [vmem:[#allocation22_spill] sm:$0xff]  ;;  %v3395_v37 = vld [vmem:[#allocation24_spill] sm:$0xff] }
 0x532   :  { %v1950_v60 = vpop.eup %1949 }
 0x533   :  { %v1289_v45 = vmul.f32 %v1950_v60, %v2857_v41  ;;  %v3386_v41 = vld [vmem:[#allocation36_spill] sm:$0xff]  ;;  %v3397_v60 = vld [vmem:[#allocation26_spill] sm:$0xff] }
 0x534   :  { %v1952_v56 = vpop.eup %1951 }
 0x535   :  { %v3007_v19 = vadd.f32 %v1290_v44, %v1289_v45  ;;  %v3396_v44 = vld [vmem:[#allocation25_spill] sm:$0xff]  ;;  %v3399_v45 = vld [vmem:[#allocation28_spill] sm:$0xff] }
 0x537   :  { %1953 = vtanh.f32 %v3007_v19 }
 0x544   :  { %v1954_v54 = vpop.eup %1953 }
 0x545   :  { %v1293_v18 = vmul.f32 %v1954_v54, %v1952_v56  ;;  %v3400_v56 = vld [vmem:[#allocation29_spill] sm:$0xff]  ;;  %v3401_v54 = vmov 0.0  }
 0x547   :  { %1359 = vmatmul.mubr.f32.vlgmr.msra.gmra.mxu0 %v1293_v18  ;;  %1430 = vmatmul.mubr.f32.vlgmr.msra.gmra.mxu1 %v1293_v18  ;;  %v3402_v18 = vld [vmem:[#allocation30_spill] sm:$0xff] }
 0x548   :  { %1465 = vmatpush1.msra.mxu0 %v2738_v6  ;;  %1536 = vmatpush1.msra.mxu1 %v2741_v27 }
 0x549   :  { %1466 = vmatprep.subr.mxu0 %v2744_v26  ;;  %1537 = vmatprep.subr.mxu1 %v2747_v31 }
 0x54a   :  { %1467 = vmatpush1.msra.mxu0 %v2750_v21  ;;  %1538 = vmatpush1.msra.mxu1 %v2753_v24 }
 0x54b   :  { %1468 = vmatprep.subr.mxu0 %v2756_v25  ;;  %1539 = vmatprep.subr.mxu1 %v2759_v29 }
 0x54c   :  { %1469 = vmatpush1.msra.mxu0 %v2762_v23  ;;  %1540 = vmatpush1.msra.mxu1 %v2765_v20 }
 0x54d   :  { %1470 = vmatprep.subr.mxu0 %v2768_v28  ;;  %1541 = vmatprep.subr.mxu1 %v2771_v35 }
 0x54e   :  { %1471 = vmatpush1.msra.mxu0 %v2774_v34  ;;  %1542 = vmatpush1.msra.mxu1 %v2777_v42 }
 0x54f   :  { %1472 = vmatprep.subr.mxu0 %v2780_v32  ;;  %1543 = vmatprep.subr.mxu1 %v2783_v58 }
 0x550   :  { %1473 = vmatpush1.msra.mxu0 %v3362_v46  ;;  %1544 = vmatpush1.msra.mxu1 %v3363_v47 }
 0x551   :  { %1474 = vmatprep.subr.mxu0 %v2792_v62  ;;  %1545 = vmatprep.subr.mxu1 %v2795_v15 }
 0x552   :  { %1475 = vmatpush1.msra.mxu0 %v2798_v0  ;;  %1546 = vmatpush1.msra.mxu1 %v2801_v22 }
 0x553   :  { %1476 = vmatprep.subr.mxu0 %v2804_v59  ;;  %1547 = vmatprep.subr.mxu1 %v2807_v61 }
 0x554   :  { %1477 = vmatpush1.msra.mxu0 %v2884_v48  ;;  %1548 = vmatpush1.msra.mxu1 %v2887_v49 }
 0x555   :  { %1478 = vmatprep.subr.mxu0 %v2890_v50  ;;  %1549 = vmatprep.subr.mxu1 %v2893_v52 }
 0x556   :  { %1479 = vmatpush1.msra.mxu0 %v2896_v53  ;;  %1550 = vmatpush1.msra.mxu1 %v2899_v55 }
 0x557   :  { %1480 = vmatprep.subr.mxu0 %v2902_v33  ;;  %1551 = vmatprep.subr.mxu1 %v2905_v63 }
 0x558   :  { %1481 = vmatpush1.msra.mxu0 %v2908_v1  ;;  %1552 = vmatpush1.msra.mxu1 %v2911_v2 }
 0x559   :  { %1482 = vmatprep.subr.mxu0 %v2914_v3  ;;  %1553 = vmatprep.subr.mxu1 %v2917_v4 }
 0x55a   :  { %1483 = vmatpush1.msra.mxu0 %v2920_v5  ;;  %1554 = vmatpush1.msra.mxu1 %v2923_v7 }
 0x55b   :  { %1484 = vmatprep.subr.mxu0 %v2926_v8  ;;  %1555 = vmatprep.subr.mxu1 %v2929_v9 }
 0x55c   :  { %1485 = vmatpush1.msra.mxu0 %v2932_v10  ;;  %1556 = vmatpush1.msra.mxu1 %v2935_v11 }
 0x55d   :  { %1486 = vmatprep.subr.mxu0 %v2938_v12  ;;  %1557 = vmatprep.subr.mxu1 %v2941_v13 }
 0x55e   :  { %1487 = vmatpush1.msra.mxu0 %v2944_v14  ;;  %1558 = vmatpush1.msra.mxu1 %v3385_v57 }
 0x55f   :  { %1488 = vmatprep.subr.mxu0 %v3386_v41  ;;  %1559 = vmatprep.subr.mxu1 %v3387_v16  ;;  %v3408_v16 = vld [vmem:[#allocation53_spill] sm:$0xff] }
 0x560   :  { %1489 = vmatpush1.msra.mxu0 %v3388_v17  ;;  %1560 = vmatpush1.msra.mxu1 %v3389_v51  ;;  %v3407_v17 = vld [vmem:[#allocation55_spill] sm:$0xff] }
 0x561   :  { %1490 = vmatprep.subr.mxu0 %v3390_v38  ;;  %1561 = vmatprep.subr.mxu1 %v3391_v39 }
 0x562   :  { %1491 = vmatpush1.msra.mxu0 %v3392_v43  ;;  %1562 = vmatpush1.msra.mxu1 %v3393_v40  ;;  %v3403_v40 = vld [vmem:[#allocation16_spill] sm:$0xff] }
 0x563   :  { %1492 = vmatprep.subr.mxu0 %v3394_v36  ;;  %1563 = vmatprep.subr.mxu1 %v3395_v37  ;;  %v3404_v36 = vld [vmem:[#allocation17_spill] sm:$0xff] }
 0x564   :  { %1493 = vmatpush1.msra.mxu0 %v3396_v44  ;;  %1564 = vmatpush1.msra.mxu1 %v3397_v60  ;;  %v3405_v44 = vld [vmem:[#allocation52_spill] sm:$0xff] }
 0x565   :  { %1494 = vmatprep.subr.mxu0 %v3398_v30  ;;  %1565 = vmatprep.subr.mxu1 %v3399_v45  ;;  %v3406_v30 = vld [vmem:[#allocation54_spill] sm:$0xff] }
 0x566   :  { %1495 = vmatpush1.msra.mxu0 %v3400_v56  ;;  %1528 = vmatprep.mubr.f32.mxu0 %v3401_v54 }
 0x567   :  { %1566 = vmatpush1.msra.mxu1 %v3402_v18  ;;  %1599 = vmatprep.mubr.f32.mxu1 %v3401_v54 }
 0x568   :  { %1634 = vmatprep.subr.mxu0 %v3403_v40  ;;  %1705 = vmatprep.subr.mxu1 %v3404_v36 }
 0x607   :  { %v1360_v37 = vpop.f32.mrf.mxu0  ;;  %v1431_v45 = vpop.f32.mrf.mxu1 }
 0x608   :  { %v1436_v43 = vadd.f32 %v1360_v37, %v3405_v44  ;;  %v1438_v54 = vadd.f32 %v1431_v45, %v3408_v16 }
 0x609   :  { %v1362_v60 = vpop.f32.mrf.mxu0  ;;  %v1433_v51 = vpop.f32.mrf.mxu1 }
 0x60a   :  { %v1857_v39 = vmul.f32 -1.442695, %v1436_v43  ;;  %v1437_v38 = vadd.f32 %v1362_v60, %v3406_v30  ;;  %v1439_v18 = vadd.f32 %v1433_v51, %v3407_v17 }
 0x60c   :  { %1955 = vpow2.f32 %v1857_v39  ;;  %v1858_v56 = vmul.f32 -1.442695, %v1437_v38  ;;  %v1859_v41 = vmul.f32 -1.442695, %v1439_v18  ;;  %v3431_v18 = vld [vmem:[#allocation60_spill] sm:$0xff] }
 0x60e   :  { %1957 = vpow2.f32 %v1858_v56 }
 0x60f   :  { %1959 = vtanh.f32 %v1438_v54 }
 0x610   :  { %1961 = vpow2.f32 %v1859_v41 }
 0x619   :  { %v1956_v40 = vpop.eup %1955 }
 0x61a   :  { %v1443_v57 = vadd.f32 1.0, %v1956_v40 }
 0x61b   :  { %v1958_v36 = vpop.eup %1957 }
 0x61c   :  { %1963 = vrcp.f32 %v1443_v57  ;;  %v1449_v37 = vadd.f32 1.0, %v1958_v36  ;;  %v1960_v43 = vpop.eup %1959 }
 0x61d   :  { %v1962_v44 = vpop.eup %1961 }
 0x61e   :  { %1965 = vrcp.f32 %v1449_v37  ;;  %v1456_v30 = vadd.f32 1.0, %v1962_v44 }
 0x620   :  { %1967 = vrcp.f32 %v1456_v30  ;;  %v3433_v30 = vld [vmem:[#allocation63_spill] sm:$0xff] }
 0x629   :  { %v1964_v39 = vpop.eup %1963 }
 0x62a   :  { %v1460_v60 = vmul.f32 %v1964_v39, %v1960_v43  ;;  %v3432_v43 = vld [vmem:[#allocation62_spill] sm:$0xff] }
 0x62b   :  { %v1966_v38 = vpop.eup %1965 }
 0x62c   :  { %v1459_v56 = vmul.f32 %v1966_v38, %v3007_v19 }
 0x62d   :  { %v1968_v16 = vpop.eup %1967 }
 0x62e   :  { %v3081_v17 = vadd.f32 %v1460_v60, %v1459_v56 }
 0x630   :  { %1969 = vtanh.f32 %v3081_v17 }
 0x63d   :  { %v1970_v51 = vpop.eup %1969 }
 0x63e   :  { %v1463_v45 = vmul.f32 %v1970_v51, %v1968_v16 }
 0x640   :  { %1529 = vmatmul.mubr.f32.vlgmr.msra.gmra.mxu0 %v1463_v45  ;;  %1600 = vmatmul.mubr.f32.vlgmr.msra.gmra.mxu1 %v1463_v45 }
 0x641   :  { %1635 = vmatpush1.msra.mxu0 %v2738_v6  ;;  %1706 = vmatpush1.msra.mxu1 %v2741_v27  ;;  %v3409_v6 = vld [vmem:[#allocation15_spill] sm:$0xff]  ;;  %v3410_v27 = vld [vmem:[#allocation36_spill] sm:$0xff] }
 0x642   :  { %1636 = vmatprep.subr.mxu0 %v2744_v26  ;;  %1707 = vmatprep.subr.mxu1 %v2747_v31  ;;  %v3411_v26 = vld [vmem:[#allocation38_spill] sm:$0xff]  ;;  %v3412_v31 = vld [vmem:[#allocation39_spill] sm:$0xff] }
 0x643   :  { %1637 = vmatpush1.msra.mxu0 %v2750_v21  ;;  %1708 = vmatpush1.msra.mxu1 %v2753_v24  ;;  %v3413_v21 = vld [vmem:[#allocation37_spill] sm:$0xff]  ;;  %v3414_v24 = vld [vmem:[#allocation19_spill] sm:$0xff] }
 0x644   :  { %1638 = vmatprep.subr.mxu0 %v2756_v25  ;;  %1709 = vmatprep.subr.mxu1 %v2759_v29  ;;  %v3415_v25 = vld [vmem:[#allocation20_spill] sm:$0xff]  ;;  %v3416_v29 = vld [vmem:[#allocation21_spill] sm:$0xff] }
 0x645   :  { %1639 = vmatpush1.msra.mxu0 %v2762_v23  ;;  %1710 = vmatpush1.msra.mxu1 %v2765_v20  ;;  %v3417_v23 = vld [vmem:[#allocation22_spill] sm:$0xff]  ;;  %v3418_v20 = vld [vmem:[#allocation23_spill] sm:$0xff] }
 0x646   :  { %1640 = vmatprep.subr.mxu0 %v2768_v28  ;;  %1711 = vmatprep.subr.mxu1 %v2771_v35  ;;  %v3419_v28 = vld [vmem:[#allocation24_spill] sm:$0xff]  ;;  %v3420_v35 = vld [vmem:[#allocation25_spill] sm:$0xff] }
 0x647   :  { %1641 = vmatpush1.msra.mxu0 %v2774_v34  ;;  %1712 = vmatpush1.msra.mxu1 %v2777_v42  ;;  %v3421_v34 = vld [vmem:[#allocation26_spill] sm:$0xff]  ;;  %v3422_v42 = vld [vmem:[#allocation27_spill] sm:$0xff] }
 0x648   :  { %1642 = vmatprep.subr.mxu0 %v2780_v32  ;;  %1713 = vmatprep.subr.mxu1 %v2783_v58  ;;  %v3423_v32 = vld [vmem:[#allocation28_spill] sm:$0xff]  ;;  %v3424_v58 = vld [vmem:[#allocation29_spill] sm:$0xff] }
 0x649   :  { %1643 = vmatpush1.msra.mxu0 %v3362_v46  ;;  %1714 = vmatpush1.msra.mxu1 %v3363_v47  ;;  %v3428_v47 = vld [vmem:[#allocation58_spill] sm:$0xff] }
 0x64a   :  { %1644 = vmatprep.subr.mxu0 %v2792_v62  ;;  %1715 = vmatprep.subr.mxu1 %v2795_v15  ;;  %v3427_v15 = vld [vmem:[#allocation56_spill] sm:$0xff] }
 0x64b   :  { %1645 = vmatpush1.msra.mxu0 %v2798_v0  ;;  %1716 = vmatpush1.msra.mxu1 %v2801_v22 }
 0x64c   :  { %1646 = vmatprep.subr.mxu0 %v2804_v59  ;;  %1717 = vmatprep.subr.mxu1 %v2807_v61  ;;  %v3425_v59 = vmov 0.0   ;;  %v3426_v61 = vld [vmem:[#allocation30_spill] sm:$0xff] }
 0x64d   :  { %1647 = vmatpush1.msra.mxu0 %v2884_v48  ;;  %1718 = vmatpush1.msra.mxu1 %v2887_v49 }
 0x64e   :  { %1648 = vmatprep.subr.mxu0 %v2890_v50  ;;  %1719 = vmatprep.subr.mxu1 %v2893_v52 }
 0x64f   :  { %1649 = vmatpush1.msra.mxu0 %v2896_v53  ;;  %1720 = vmatpush1.msra.mxu1 %v2899_v55  ;;  %v3429_v53 = vld [vmem:[#allocation59_spill] sm:$0xff] }
 0x650   :  { %1650 = vmatprep.subr.mxu0 %v2902_v33  ;;  %1721 = vmatprep.subr.mxu1 %v2905_v63  ;;  %v3430_v33 = vld [vmem:[#allocation57_spill] sm:$0xff] }
 0x651   :  { %1651 = vmatpush1.msra.mxu0 %v2908_v1  ;;  %1722 = vmatpush1.msra.mxu1 %v2911_v2 }
 0x652   :  { %1652 = vmatprep.subr.mxu0 %v2914_v3  ;;  %1723 = vmatprep.subr.mxu1 %v2917_v4 }
 0x653   :  { %1653 = vmatpush1.msra.mxu0 %v2920_v5  ;;  %1724 = vmatpush1.msra.mxu1 %v2923_v7 }
 0x654   :  { %1654 = vmatprep.subr.mxu0 %v2926_v8  ;;  %1725 = vmatprep.subr.mxu1 %v2929_v9 }
 0x655   :  { %1655 = vmatpush1.msra.mxu0 %v2932_v10  ;;  %1726 = vmatpush1.msra.mxu1 %v2935_v11 }
 0x656   :  { %1656 = vmatprep.subr.mxu0 %v2938_v12  ;;  %1727 = vmatprep.subr.mxu1 %v2941_v13 }
 0x657   :  { %1657 = vmatpush1.msra.mxu0 %v2944_v14  ;;  %1728 = vmatpush1.msra.mxu1 %v3409_v6 }
 0x658   :  { %1658 = vmatprep.subr.mxu0 %v3410_v27  ;;  %1729 = vmatprep.subr.mxu1 %v3411_v26 }
 0x659   :  { %1659 = vmatpush1.msra.mxu0 %v3412_v31  ;;  %1730 = vmatpush1.msra.mxu1 %v3413_v21 }
 0x65a   :  { %1660 = vmatprep.subr.mxu0 %v3414_v24  ;;  %1731 = vmatprep.subr.mxu1 %v3415_v25 }
 0x65b   :  { %1661 = vmatpush1.msra.mxu0 %v3416_v29  ;;  %1732 = vmatpush1.msra.mxu1 %v3417_v23 }
 0x65c   :  { %1662 = vmatprep.subr.mxu0 %v3418_v20  ;;  %1733 = vmatprep.subr.mxu1 %v3419_v28 }
 0x65d   :  { %1663 = vmatpush1.msra.mxu0 %v3420_v35  ;;  %1734 = vmatpush1.msra.mxu1 %v3421_v34 }
 0x65e   :  { %1664 = vmatprep.subr.mxu0 %v3422_v42  ;;  %1735 = vmatprep.subr.mxu1 %v3423_v32 }
 0x65f   :  { %1665 = vmatpush1.msra.mxu0 %v3424_v58  ;;  %1698 = vmatprep.mubr.f32.mxu0 %v3425_v59 }
 0x660   :  { %1736 = vmatpush1.msra.mxu1 %v3426_v61  ;;  %1769 = vmatprep.mubr.f32.mxu1 %v3425_v59 }
 0x700   :  { %v1530_v62 = vpop.f32.mrf.mxu0  ;;  %v1601_v49 = vpop.f32.mrf.mxu1 }
 0x701   :  { %v1606_v0 = vadd.f32 %v1530_v62, %v3427_v15  ;;  %v1608_v63 = vadd.f32 %v1601_v49, %v3430_v33 }
 0x702   :  { %v1532_v22 = vpop.f32.mrf.mxu0  ;;  %v1603_v52 = vpop.f32.mrf.mxu1 }
 0x703   :  { %v1860_v46 = vmul.f32 -1.442695, %v1606_v0  ;;  %v1607_v48 = vadd.f32 %v1532_v22, %v3428_v47  ;;  %v1609_v55 = vadd.f32 %v1603_v52, %v3429_v53 }
 0x705   :  { %1971 = vpow2.f32 %v1860_v46  ;;  %v1861_v50 = vmul.f32 -1.442695, %v1607_v48  ;;  %v1862_v1 = vmul.f32 -1.442695, %v1609_v55 }
 0x707   :  { %1973 = vpow2.f32 %v1861_v50 }
 0x708   :  { %1975 = vtanh.f32 %v1608_v63 }
 0x709   :  { %1977 = vpow2.f32 %v1862_v1 }
 0x712   :  { %v1972_v2 = vpop.eup %1971 }
 0x713   :  { %v1613_v3 = vadd.f32 1.0, %v1972_v2 }
 0x714   :  { %v1974_v4 = vpop.eup %1973 }
 0x715   :  { %1979 = vrcp.f32 %v1613_v3  ;;  %v1619_v5 = vadd.f32 1.0, %v1974_v4  ;;  %v1976_v7 = vpop.eup %1975 }
 0x716   :  { %v1978_v8 = vpop.eup %1977 }
 0x717   :  { %1981 = vrcp.f32 %v1619_v5  ;;  %v1626_v12 = vadd.f32 1.0, %v1978_v8 }
 0x719   :  { %1983 = vrcp.f32 %v1626_v12 }
 0x722   :  { %v1980_v9 = vpop.eup %1979 }
 0x723   :  { %v1630_v10 = vmul.f32 %v1980_v9, %v1976_v7 }
 0x724   :  { %v1982_v11 = vpop.eup %1981 }
 0x725   :  { %v1629_v13 = vmul.f32 %v1982_v11, %v3081_v17  ;;  %v3434_v17 = vld [vmem:[#allocation61_spill] sm:$0xff] }
 0x726   :  { %v1984_v19 = vpop.eup %1983 }
 0x727   :  { %v1631_v14 = vadd.f32 %v1630_v10, %v1629_v13 }
 0x729   :  { %1985 = vtanh.f32 %v1631_v14 }
 0x736   :  { %v1986_v57 = vpop.eup %1985 }
 0x737   :  { %v1633_v41 = vmul.f32 %v1986_v57, %v1984_v19 }
 0x739   :  { %1699 = vmatmul.mubr.f32.vlgmr.msra.gmra.mxu0 %v1633_v41  ;;  %1770 = vmatmul.mubr.f32.vlgmr.msra.gmra.mxu1 %v1633_v41 }
 0x7f9   :  { %v1700_v54 = vpop.f32.mrf.mxu0  ;;  %v1771_v39 = vpop.f32.mrf.mxu1 }
 0x7fa   :  { %v1776_v40 = vadd.f32 %v1700_v54, %v3431_v18  ;;  %v1778_v16 = vadd.f32 %v1771_v39, %v3434_v17 }
 0x7fb   :  { %v1702_v36 = vpop.f32.mrf.mxu0  ;;  %v1773_v38 = vpop.f32.mrf.mxu1 }
 0x7fc   :  { %v1863_v37 = vmul.f32 -1.442695, %v1776_v40  ;;  %v1777_v44 = vadd.f32 %v1702_v36, %v3432_v43  ;;  %v1779_v56 = vadd.f32 %v1773_v38, %v3433_v30 }
 0x7fe   :  { %1987 = vpow2.f32 %v1863_v37  ;;  %v1864_v60 = vmul.f32 -1.442695, %v1777_v44  ;;  %v1865_v51 = vmul.f32 -1.442695, %v1779_v56 }
 0x800   :  { %1989 = vpow2.f32 %v1864_v60 }
 0x801   :  { %1991 = vtanh.f32 %v1778_v16 }
 0x802   :  { %1993 = vpow2.f32 %v1865_v51 }
 0x80b   :  { %v1988_v45 = vpop.eup %1987 }
 0x80c   :  { %v1783_v6 = vadd.f32 1.0, %v1988_v45 }
 0x80d   :  { %v1990_v27 = vpop.eup %1989 }
 0x80e   :  { %1995 = vrcp.f32 %v1783_v6  ;;  %v1789_v26 = vadd.f32 1.0, %v1990_v27  ;;  %v1992_v31 = vpop.eup %1991 }
 0x80f   :  { %v1994_v21 = vpop.eup %1993 }
 0x810   :  { %1997 = vrcp.f32 %v1789_v26  ;;  %v1796_v23 = vadd.f32 1.0, %v1994_v21 }
 0x812   :  { %1999 = vrcp.f32 %v1796_v23 }
 0x81b   :  { %v1996_v24 = vpop.eup %1995 }
 0x81c   :  { %v1800_v25 = vmul.f32 %v1996_v24, %v1992_v31 }
 0x81d   :  { %v1998_v29 = vpop.eup %1997 }
 0x81e   :  { %v1799_v20 = vmul.f32 %v1998_v29, %v1631_v14 }
 0x81f   :  { %v2000_v35 = vpop.eup %1999 }
 0x820   :  { %v1801_v28 = vadd.f32 %v1800_v25, %v1799_v20 }
 0x822   :  { %2001 = vtanh.f32 %v1801_v28 }
 0x82f   :  { %v2002_v34 = vpop.eup %2001 }
 0x830   :  { %v1803_v42 = vmul.f32 %v2002_v34, %v2000_v35 }
 0x832   :  { %1809 = vst [vmem:[#allocation10] sm:$0xff] %v1803_v42 }
 0x833   :  { %2138 = shalt.err (!%p2135_p5)
}
 0x834   :  { %1819 = dma.vmem_to_hbm [thread:$0]  %s1817_s7, 128, %s3164_s4, [#allocation6]  }
 0x835   :  { %2151 = dma.done.wait [#allocation6], 128  }
 0x836   :  { %2152 = vsyncadd [#allocation6], 4294967168 }
 0x837   :  { %1823 = vsyncpa [#allocation5], 1 }
 0x838   :  { %1824 = vsyncpa [#allocation8], 1 }
 0x839   :  { %1825 = vsyncpa [#allocation6], 1 }

</bundles_post_ra>
